<compile_context>
chip_gen: v7x
topology: tpu7x:2x2x1
jax: 0.10.0
libtpu: 0.0.40
codegen_flags: <defaults>
</compile_context>

<pallas_src>
import functools

import jax
import jax.numpy as jnp
from jax.experimental import pallas as pl
from jax.experimental.pallas import tpu as pltpu


# ----------------------------------------------------------------------------- helpers
def _tpu_device_kind():
    try:
        return jax.devices()[0].device_kind.lower()
    except Exception:
        return None


def _pick_query_tile(n, tq_max):
    """Largest lane-dense query tile: full N for small maps, else a 128-multiple divisor."""
    if n <= tq_max:
        return n
    t = (tq_max // 128) * 128
    while t >= 128:
        if n % t == 0:
            return t
        t -= 128
    # TODO(synk): padded/ragged query-tile path for large N with no 128-multiple divisor;
    # falling back to one full-N tile can pressure VMEM for very large feature maps.
    return n


def pack_self_attention_weights(wq, bq, wk, bk, wv, bv):
    """Pack the three 1x1-conv projections into one fused (2*C8p + C, C) matmul.

    Call once per layer (outside the per-forward wrapper); zero-padded q/k rows and
    zero biases contribute exactly 0 to the attention energy, so results are unchanged.
    """
    c8, c = wq.shape
    assert wk.shape == (c8, c) and wv.shape == (c, c)
    c8p = max(8, ((c8 + 7) // 8) * 8)          # pad q/k channels to a sublane multiple
    rows = 2 * c8p + c

    w_all = jnp.zeros((rows, c), jnp.float32)
    w_all = w_all.at[:c8, :].set(wq.astype(jnp.float32))
    w_all = w_all.at[c8p:c8p + c8, :].set(wk.astype(jnp.float32))
    w_all = w_all.at[2 * c8p:, :].set(wv.astype(jnp.float32))

    b_all = jnp.zeros((rows,), jnp.float32)
    b_all = b_all.at[:c8].set(bq.astype(jnp.float32))
    b_all = b_all.at[c8p:c8p + c8].set(bk.astype(jnp.float32))
    b_all = b_all.at[2 * c8p:].set(bv.astype(jnp.float32))

    return {
        "w": w_all.astype(jnp.bfloat16),               # (2*C8p + C, C) bf16 — MXU operand
        "b": b_all.reshape(rows, 1).astype(jnp.float32),  # (2*C8p + C, 1) f32
        "c8p": c8p,
        "c": c,
    }


# ----------------------------------------------------------------------------- kernel
def _self_attention_kernel(x_ref, w_ref, b_ref, gamma_ref, o_ref,
                           q_s, kT_s, v_s, *, c8p, tq, exp_bf16):
    qt = pl.program_id(1)

    # ---- once per batch element: fused Q/K/V projection into resident VMEM scratch ----
    @pl.when(qt == 0)
    def _():
        xb = x_ref[0].astype(jnp.bfloat16)                                     # (C, N) bf16
        qkv = jnp.dot(w_ref[...], xb,
                      preferred_element_type=jnp.float32) + b_ref[...]         # (R, N) f32
        q_s[...] = qkv[0:c8p, :].astype(jnp.bfloat16)                          # (C8p, N)
        # K stored transposed ONCE so the per-tile energy matmul is canonical (no XLU work
        # repeated per query tile).
        kT_s[...] = jnp.transpose(qkv[c8p:2 * c8p, :]).astype(jnp.bfloat16)    # (N, C8p)
        v_s[...] = qkv[2 * c8p:, :].astype(jnp.bfloat16)                       # (C, N)

    # ---- per query tile: both matmuls in canonical MXU form, no transposes ------------
    start = pl.multiple_of(qt * tq, tq)
    q_t = q_s[:, pl.ds(start, tq)]                                             # (C8p, TQ) bf16

    # energyT[n, t] = <k_n, q_t>   (keys on sublanes, queries on lanes)
    energy_t = jnp.dot(kT_s[...], q_t, preferred_element_type=jnp.float32)     # (N, TQ) f32
    m = jnp.max(energy_t, axis=0, keepdims=True)                               # (1, TQ)
    e = energy_t - m
    if exp_bf16:
        # v6e/v7x: bf16 EUP ~2x f32 rate; denominator accumulation stays f32.
        p = jnp.exp(e.astype(jnp.bfloat16))                                    # (N, TQ) bf16
        denom = jnp.sum(p.astype(jnp.float32), axis=0, keepdims=True)          # (1, TQ) f32
        attn_t = p * pl.reciprocal(denom, approx=True).astype(jnp.bfloat16)    # (N, TQ) bf16
    else:
        # v5e: no bf16 EUP/VPU — keep the exp and normalization in f32.
        p = jnp.exp(e)
        denom = jnp.sum(p, axis=0, keepdims=True)
        attn_t = (p * pl.reciprocal(denom, approx=True)).astype(jnp.bfloat16)

    # out[c, t] = sum_n v[c, n] * attnT[n, t]   — canonical (C, N) @ (N, TQ)
    out = jnp.dot(v_s[...], attn_t, preferred_element_type=jnp.float32)        # (C, TQ) f32

    x_t = x_ref[0, :, pl.ds(start, tq)].astype(jnp.float32)                    # (C, TQ) f32
    o_ref[0] = (x_t + gamma_ref[0] * out).astype(o_ref.dtype)


# ----------------------------------------------------------------------------- wrapper
def self_attention_pallas(x_nchw, packed, gamma, *, tq_max=None, exp_bf16=None,
                          vmem_limit_bytes=None):
    """x_nchw: (B, C, H, W); `packed` from pack_self_attention_weights; gamma scalar."""
    B, C, H, W = x_nchw.shape
    N = H * W
    c8p = packed["c8p"]
    rows = 2 * c8p + C
    assert packed["c"] == C

    kind = _tpu_device_kind()
    is_v7 = kind is not None and ("v7" in kind or "7x" in kind)
    newer = is_v7 or (kind is not None and "v6" in kind)
    if tq_max is None:
        tq_max = 256 if newer else 128           # v6e/v7x MXU is 256-wide; v5e is 128
    if exp_bf16 is None:
        exp_bf16 = newer                         # bf16 EUP only on v6e/v7x
    if vmem_limit_bytes is None:
        vmem_limit_bytes = (48 if is_v7 else 64) * 1024 * 1024

    TQ = _pick_query_tile(N, tq_max)
    NT = N // TQ

    # NCHW -> (B, C, N): pure reshape (N already the fast axis), no transpose.
    x_bcn = x_nchw.reshape(B, C, N)
    gamma_s = jnp.asarray(gamma, jnp.float32).reshape(1)

    kernel = functools.partial(_self_attention_kernel, c8p=c8p, tq=TQ, exp_bf16=exp_bf16)

    out_bcn = pl.pallas_call(
        kernel,
        out_shape=jax.ShapeDtypeStruct((B, C, N), x_bcn.dtype),
        grid_spec=pltpu.PrefetchScalarGridSpec(
            num_scalar_prefetch=0,
            grid=(B, NT),
            in_specs=[
                pl.BlockSpec((1, C, N), lambda b, q: (b, 0, 0)),     # x (resident across q tiles)
                pl.BlockSpec((rows, C), lambda b, q: (0, 0)),        # fused [Wq|Wk|Wv] bf16
                pl.BlockSpec((rows, 1), lambda b, q: (0, 0)),        # fused [bq|bk|bv] f32
                pl.BlockSpec(memory_space=pltpu.MemorySpace.SMEM),   # gamma scalar
            ],
            out_specs=pl.BlockSpec((1, C, TQ), lambda b, q: (b, 0, q)),
            scratch_shapes=[
                pltpu.VMEM((c8p, N), jnp.bfloat16),   # Q  (bf16; sliced per tile as matmul RHS)
                pltpu.VMEM((N, c8p), jnp.bfloat16),   # K^T (transposed once per batch)
                pltpu.VMEM((C, N), jnp.bfloat16),     # V
            ],
        ),
        compiler_params=pltpu.CompilerParams(
            dimension_semantics=("parallel", "arbitrary"),
            vmem_limit_bytes=vmem_limit_bytes,
        ),
    )(x_bcn, packed["w"], packed["b"], gamma_s)

    # (B, C, N) -> NCHW: pure reshape.
    return out_bcn.reshape(B, C, H, W)


# ----------------------------------------------------------------------------- reference
def self_attention_ref(x_nchw, wq, bq, wk, bk, wv, bv, gamma):
    """Pure-JAX f32 reference mirroring the PyTorch forward exactly."""
    B, C, H, W = x_nchw.shape
    N = H * W
    x = x_nchw.reshape(B, C, N)                                 # (B, C, N)
    q = jnp.einsum('oc,bcn->bon', wq, x) + bq[None, :, None]    # (B, C8, N)
    k = jnp.einsum('oc,bcn->bon', wk, x) + bk[None, :, None]    # (B, C8, N)
    v = jnp.einsum('oc,bcn->bon', wv, x) + bv[None, :, None]    # (B, C,  N)
    energy = jnp.einsum('bci,bcj->bij', q, k)                   # (B, N, N)
    attn = jax.nn.softmax(energy, axis=-1)
    out = jnp.einsum('bcj,bij->bci', v, attn)                   # value @ attn^T
    return x_nchw + (gamma * out).reshape(B, C, H, W)


if __name__ == "__main__":
    B, C, H, W = 2, 64, 16, 16        # dim=64 -> dim//8 = 8, N = 256
    C8 = C // 8

    key = jax.random.PRNGKey(0)
    kx, kwq, kbq, kwk, kbk, kwv, kbv = jax.random.split(key, 7)

    x = jax.random.normal(kx, (B, C, H, W), dtype=jnp.float32)

    # Conv2d(kernel_size=1) weights: (C_out, C_in); deterministic init.
    wq = 0.1 * jax.random.normal(kwq, (C8, C), dtype=jnp.float32)
    bq = 0.1 * jax.random.normal(kbq, (C8,), dtype=jnp.float32)
    wk = 0.1 * jax.random.normal(kwk, (C8, C), dtype=jnp.float32)
    bk = 0.1 * jax.random.normal(kbk, (C8,), dtype=jnp.float32)
    wv = 0.1 * jax.random.normal(kwv, (C, C), dtype=jnp.float32)
    bv = 0.1 * jax.random.normal(kbv, (C,), dtype=jnp.float32)
    # Module __init__ uses gamma = zeros(1); use a nonzero value so the attention
    # path is actually exercised (deterministic either way).
    gamma = jnp.float32(0.5)

    # Weight packing happens once per layer, not per forward call.
    packed = pack_self_attention_weights(wq, bq, wk, bk, wv, bv)
    packed = jax.tree_util.tree_map(
        lambda a: jax.block_until_ready(a) if isinstance(a, jax.Array) else a, packed)

    out = self_attention_pallas(x, packed, gamma)
    out = jax.block_until_ready(out)

    ref = self_attention_ref(x, wq, bq, wk, bk, wv, bv, gamma)
    assert out.shape == (B, C, H, W)
    # bf16 MXU operands (and bf16 softmax exp on v6e/v7x) with f32 accumulation.
    assert jnp.allclose(out, ref, atol=5e-2, rtol=5e-2), \
        f"max abs err = {jnp.max(jnp.abs(out - ref))}"

    print("KERNEL_OK")
</pallas_src>

<mosaic_0001>
module attributes {stable_mosaic.version = 11 : i64} {
  func.func @_self_attention_kernel(%arg0: i32, %arg1: i32, %arg2: memref<1x64x256xf32, #tpu.memory_space<vmem>>, %arg3: memref<80x64xbf16, #tpu.memory_space<vmem>>, %arg4: memref<80x1xf32, #tpu.memory_space<vmem>>, %arg5: memref<1xf32, #tpu.memory_space<smem>>, %arg6: memref<1x64x128xf32, #tpu.memory_space<vmem>>, %arg7: memref<8x256xbf16, #tpu.memory_space<vmem>>, %arg8: memref<256x8xbf16, #tpu.memory_space<vmem>>, %arg9: memref<64x256xbf16, #tpu.memory_space<vmem>>) attributes {dimension_semantics = [#tpu.dimension_semantics<parallel>, #tpu.dimension_semantics<arbitrary>], iteration_bounds = array<i64: 2, 2>, scalar_prefetch = 0 : i64, scratch_operands = 3 : i64, tpu.core_type = #tpu.core_type<tc>, window_params = [{transform_indices = @transform_0, window_bounds = array<i64: 1, 64, 256>}, {pipeline_mode = #tpu.pipeline_mode<synchronous>, transform_indices = @transform_1, window_bounds = array<i64: 80, 64>}, {pipeline_mode = #tpu.pipeline_mode<synchronous>, transform_indices = @transform_2, window_bounds = array<i64: 80, 1>}, {transform_indices = @transform_3, window_bounds = array<i64: 1>}, {transform_indices = @transform_4, window_bounds = array<i64: 1, 64, 128>}]} {
    %c0_i32 = arith.constant 0 : i32
    %0 = arith.cmpi eq, %arg1, %c0_i32 : i32
    %1 = arith.extui %0 : i1 to i32
    %c0_i32_0 = arith.constant 0 : i32
    %2 = arith.cmpi ne, %1, %c0_i32_0 : i32
    scf.if %2 {
      %c0_14 = arith.constant 0 : index
      %c0_15 = arith.constant 0 : index
      %c0_16 = arith.constant 0 : index
      %32 = vector.load %arg2[%c0_14, %c0_15, %c0_16] : memref<1x64x256xf32, #tpu.memory_space<vmem>>, vector<1x64x256xf32>
      %33 = vector.shape_cast %32 : vector<1x64x256xf32> to vector<64x256xf32>
      %34 = arith.truncf %33 : vector<64x256xf32> to vector<64x256xbf16>
      %c0_17 = arith.constant 0 : index
      %c0_18 = arith.constant 0 : index
      %35 = vector.load %arg3[%c0_17, %c0_18] : memref<80x64xbf16, #tpu.memory_space<vmem>>, vector<80x64xbf16>
      %cst_19 = arith.constant dense<0.000000e+00> : vector<80x256xf32>
      %36 = tpu.matmul %35, %34, %cst_19 {dimension_numbers = #tpu.dot_dimension_numbers<[1], [0], [0], [1], [0, 0, 1, 1], [], []>} : vector<80x64xbf16>, vector<64x256xbf16>, vector<80x256xf32> -> vector<80x256xf32>
      %c0_20 = arith.constant 0 : index
      %c0_21 = arith.constant 0 : index
      %37 = vector.load %arg4[%c0_20, %c0_21] : memref<80x1xf32, #tpu.memory_space<vmem>>, vector<80x1xf32>
      %38 = vector.broadcast %37 : vector<80x1xf32> to vector<80x256xf32>
      %39 = arith.addf %36, %38 : vector<80x256xf32>
      %40 = vector.extract_strided_slice %39 {offsets = [0, 0], sizes = [8, 256], strides = [1, 1]} : vector<80x256xf32> to vector<8x256xf32>
      %41 = arith.truncf %40 : vector<8x256xf32> to vector<8x256xbf16>
      %c0_22 = arith.constant 0 : index
      %c0_23 = arith.constant 0 : index
      %42 = vector.load %arg7[%c0_22, %c0_23] : memref<8x256xbf16, #tpu.memory_space<vmem>>, vector<8x256xbf16>
      tpu.vector_store %arg7[%c0_22, %c0_23], %41 {strides = array<i32>} : memref<8x256xbf16, #tpu.memory_space<vmem>>, vector<8x256xbf16>,
      %43 = vector.extract_strided_slice %39 {offsets = [8, 0], sizes = [8, 256], strides = [1, 1]} : vector<80x256xf32> to vector<8x256xf32>
      %44 = tpu.transpose %43, [1, 0] : vector<8x256xf32> -> vector<256x8xf32>
      %45 = arith.truncf %44 : vector<256x8xf32> to vector<256x8xbf16>
      %c0_24 = arith.constant 0 : index
      %c0_25 = arith.constant 0 : index
      %46 = vector.load %arg8[%c0_24, %c0_25] : memref<256x8xbf16, #tpu.memory_space<vmem>>, vector<256x8xbf16>
      tpu.vector_store %arg8[%c0_24, %c0_25], %45 {strides = array<i32>} : memref<256x8xbf16, #tpu.memory_space<vmem>>, vector<256x8xbf16>,
      %47 = vector.extract_strided_slice %39 {offsets = [16, 0], sizes = [64, 256], strides = [1, 1]} : vector<80x256xf32> to vector<64x256xf32>
      %48 = arith.truncf %47 : vector<64x256xf32> to vector<64x256xbf16>
      %c0_26 = arith.constant 0 : index
      %c0_27 = arith.constant 0 : index
      %49 = vector.load %arg9[%c0_26, %c0_27] : memref<64x256xbf16, #tpu.memory_space<vmem>>, vector<64x256xbf16>
      tpu.vector_store %arg9[%c0_26, %c0_27], %48 {strides = array<i32>} : memref<64x256xbf16, #tpu.memory_space<vmem>>, vector<64x256xbf16>,
    } else {
    }
    %c128_i32 = arith.constant 128 : i32
    %3 = arith.muli %arg1, %c128_i32 : i32
    %4 = tpu.assume_multiple %3, 128 : i32
    %c0 = arith.constant 0 : index
    %5 = arith.index_cast %4 : i32 to index
    %6 = vector.load %arg7[%c0, %5] : memref<8x256xbf16, #tpu.memory_space<vmem>>, vector<8x128xbf16>
    %c0_1 = arith.constant 0 : index
    %c0_2 = arith.constant 0 : index
    %7 = vector.load %arg8[%c0_1, %c0_2] : memref<256x8xbf16, #tpu.memory_space<vmem>>, vector<256x8xbf16>
    %cst = arith.constant dense<0.000000e+00> : vector<256x128xf32>
    %8 = tpu.matmul %7, %6, %cst {dimension_numbers = #tpu.dot_dimension_numbers<[1], [0], [0], [1], [0, 0, 1, 1], [], []>} : vector<256x8xbf16>, vector<8x128xbf16>, vector<256x128xf32> -> vector<256x128xf32>
    %cst_3 = arith.constant dense<0xFF800000> : vector<128xf32>
    %9 = vector.multi_reduction <maximumf>, %8, %cst_3 [0] : vector<256x128xf32> to vector<128xf32>
    %10 = vector.shape_cast %9 : vector<128xf32> to vector<1x128xf32>
    %11 = vector.broadcast %10 : vector<1x128xf32> to vector<256x128xf32>
    %12 = arith.subf %8, %11 : vector<256x128xf32>
    %13 = math.exp %12 : vector<256x128xf32>
    %cst_4 = arith.constant dense<0.000000e+00> : vector<128xf32>
    %14 = vector.multi_reduction <add>, %13, %cst_4 [0] : vector<256x128xf32> to vector<128xf32>
    %15 = vector.shape_cast %14 : vector<128xf32> to vector<1x128xf32>
    %16 = tpu.reciprocal %15 {approx = true} : vector<1x128xf32> -> vector<1x128xf32>
    %17 = vector.broadcast %16 : vector<1x128xf32> to vector<256x128xf32>
    %18 = arith.mulf %13, %17 : vector<256x128xf32>
    %19 = arith.truncf %18 : vector<256x128xf32> to vector<256x128xbf16>
    %c0_5 = arith.constant 0 : index
    %c0_6 = arith.constant 0 : index
    %20 = vector.load %arg9[%c0_5, %c0_6] : memref<64x256xbf16, #tpu.memory_space<vmem>>, vector<64x256xbf16>
    %cst_7 = arith.constant dense<0.000000e+00> : vector<64x128xf32>
    %21 = tpu.matmul %20, %19, %cst_7 {dimension_numbers = #tpu.dot_dimension_numbers<[1], [0], [0], [1], [0, 0, 1, 1], [], []>} : vector<64x256xbf16>, vector<256x128xbf16>, vector<64x128xf32> -> vector<64x128xf32>
    %c0_8 = arith.constant 0 : index
    %c0_9 = arith.constant 0 : index
    %22 = arith.index_cast %4 : i32 to index
    %23 = vector.load %arg2[%c0_8, %c0_9, %22] : memref<1x64x256xf32, #tpu.memory_space<vmem>>, vector<1x64x128xf32>
    %24 = vector.shape_cast %23 : vector<1x64x128xf32> to vector<64x128xf32>
    %c0_10 = arith.constant 0 : index
    %25 = memref.load %arg5[%c0_10] : memref<1xf32, #tpu.memory_space<smem>>
    %26 = vector.broadcast %25 : f32 to vector<64x128xf32>
    %27 = arith.mulf %26, %21 : vector<64x128xf32>
    %28 = arith.addf %24, %27 : vector<64x128xf32>
    %c0_11 = arith.constant 0 : index
    %c0_12 = arith.constant 0 : index
    %c0_13 = arith.constant 0 : index
    %29 = vector.load %arg6[%c0_11, %c0_12, %c0_13] : memref<1x64x128xf32, #tpu.memory_space<vmem>>, vector<1x64x128xf32>
    %30 = vector.shape_cast %29 : vector<1x64x128xf32> to vector<64x128xf32>
    %31 = vector.shape_cast %28 : vector<64x128xf32> to vector<1x64x128xf32>
    tpu.vector_store %arg6[%c0_11, %c0_12, %c0_13], %31 {strides = array<i32>} : memref<1x64x128xf32, #tpu.memory_space<vmem>>, vector<1x64x128xf32>,
    return
  }
  func.func @transform_0(%arg0: i32, %arg1: i32) -> (i32, i32, i32) {
    %c0_i32 = arith.constant 0 : i32
    %c0_i32_0 = arith.constant 0 : i32
    %c0_i32_1 = arith.constant 0 : i32
    return %arg0, %c0_i32, %c0_i32_0 : i32, i32, i32
  }
  func.func @transform_1(%arg0: i32, %arg1: i32) -> (i32, i32) {
    %c0_i32 = arith.constant 0 : i32
    %c0_i32_0 = arith.constant 0 : i32
    %c0_i32_1 = arith.constant 0 : i32
    return %c0_i32, %c0_i32_0 : i32, i32
  }
  func.func @transform_2(%arg0: i32, %arg1: i32) -> (i32, i32) {
    %c0_i32 = arith.constant 0 : i32
    %c0_i32_0 = arith.constant 0 : i32
    %c0_i32_1 = arith.constant 0 : i32
    return %c0_i32, %c0_i32_0 : i32, i32
  }
  func.func @transform_3(%arg0: i32, %arg1: i32) -> i32 {
    %c0_i32 = arith.constant 0 : i32
    %c0_i32_0 = arith.constant 0 : i32
    return %c0_i32 : i32
  }
  func.func @transform_4(%arg0: i32, %arg1: i32) -> (i32, i32, i32) {
    %c0_i32 = arith.constant 0 : i32
    %c0_i32_0 = arith.constant 0 : i32
    return %arg0, %c0_i32, %arg1 : i32, i32, i32
  }
}

</mosaic_0001>

<bundles_post_ra>
// kernel: tpu_custom_call.1
= control target key start
LH: loop header
LB: loop body
LE: loop exit
PB: predicated region body
PF: predicated region fallthrough
CT: control target
= control target key end

     0   :  { %s2658_s0 = inlined_call_operand.hbm [shape: f32[2,64,256], index: 0, kind: input, shape index: {}]   ;;  %s2659_s1 = inlined_call_operand.hbm [shape: bf16[80,64], index: 1, kind: input, shape index: {}]   ;;  %s2660_s2 = inlined_call_operand.hbm [shape: f32[80,1], index: 2, kind: input, shape index: {}]   ;;  %s2661_s3 = inlined_call_operand.<no memory space> [shape: f32[1], index: 3, kind: input, shape index: {}]   ;;  %s2662_s4 = inlined_call_operand.hbm [shape: f32[2,64,256], index: 4, kind: output, shape index: {}]  }
   0x1   :  { %2672 = sst [smem:[#allocation20_spill]] %s2659_s1 }
   0x2   :  { %2673 = sst [smem:[#allocation21_spill]] %s2660_s2 }
   0x3   :  { %9 = sst [smem:[#allocation5]] %s2661_s3 }
   0x4   :  { %10 = vsyncpa [#allocation7], 0 }
   0x5   :  { %12 = vsyncpa [#allocation7 + $0x1], 0 }
   0x6   :  { %13 = vsyncpa [#allocation10], 0 }
   0x7   :  { %14 = vsyncpa [#allocation8], 0 }
   0x8   :  { %16 = vsyncpa [#allocation8 + $0x1], 0  ;;  %s1990_s17 = smov 0   ;;  %s1992_s18 = smov 0  }
   0x9   :  { %s1994_s19 = smov 0   ;;  %s1996_s20 = smov 0  }
   0xa   :  { %s1998_s21 = smov 0   ;;  %s2000_s22 = smov 0  }
   0xb   :  { %s2002_s23 = smov 0   ;;  %s2004_s3 = smov 0  }
   0xc   :  { %s2006_s24 = smov 0   ;;  %s2008_s25 = smov 0  }
   0xd   :  { %s2010_s26 = smov 0  }
   0xe LB: > { %2674 = sst [smem:[#allocation16_spill]] %s1906_s17  ;;  %s1293_s27 = sadd.s32 4294967295, %s1946_s26   ;;  %s1946_s26 = sphi %s2010_s26, %s22_s26   ;;  %s1942_s25 = sphi %s2008_s25, %s2705_s25   ;;  %s1938_s24 = sphi %s2006_s24, %s2697_s24   ;;  %s1934_s3 = sphi %s2004_s3, %s2704_s3   ;;  %s1930_s23 = sphi %s2002_s23, %s2696_s23   ;;  %s1926_s22 = sphi %s2000_s22, %s2703_s22   ;;  %s1922_s21 = sphi %s1998_s21, %s2702_s21   ;;  %s1918_s20 = sphi %s1996_s20, %s2701_s20   ;;  %s1914_s19 = sphi %s1994_s19, %s2700_s19   ;;  %s1910_s18 = sphi %s1992_s18, %s2699_s18   ;;  %s1906_s17 = sphi %s1990_s17, %s2698_s17  }
   0xf   : > { %2675 = sst [smem:[#allocation17_spill]] %s1938_s24  ;;  %s1294_s28 = sadd.s32 4294967294, %s1946_s26  }
  0x10   : > { %p54_p0 = scmp.ne.s32.totalorder %s1922_s21, %s1918_s20  ;;  %p2046_p1 = scmp.eq.s32.totalorder %s1293_s27, 0 }
  0x11   : > { %p142_p2 = scmp.ne.s32.totalorder %s1914_s19, %s1910_s18  ;;  %p143_p4 = scmp.eq.s32.totalorder %s1293_s27, 3 }
  0x12   : > { %s2676_s29 = scalar_select %p2046_p1, 1, 0 }
  0x13   : > { %p2055_p3 = por %p2046_p1, %p54_p0  ;;  %p148_p5 = scmp.ne.s32.totalorder %s1910_s18, %s1906_s17 }
  0x14   : > { %p149_p6 = scmp.eq.s32.totalorder %s1294_s28, 3  ;;  %p2061_p7 = por %p143_p4, %p142_p2 }
  0x15   : > { %s2677_s5 = scalar_select %p2055_p3, 1, 0 }
  0x16   : > { %s2678_s6 = scalar_select %p2061_p7, 1, 0 }
  0x17   : > { %p1295_p8 = scmp.ge.s32.totalorder %s1946_s26, 1  ;;  %p2066_p9 = por %p149_p6, %p148_p5 }
  0x18   : > { %p156_p10 = scmp.lt.s32.totalorder %s1946_s26, 5  ;;  %s1948_s9 = smov [#allocation9]  }
  0x19   : > { %s2679_s7 = scalar_select %p2066_p9, 1, 0 }
  0x1a   : > { %p2071_p11 = pnand %p1295_p8, %p156_p10  ;;  %s168_s10 = sshll.u32 %s1948_s9, 4  ;;  %s169_s10 = int_to_ptr.vmem [resolvable:$true] %s168_s10 }
  0x1b   : > { %2680 = sst [smem:[#allocation18_spill]] %s2679_s7  ;;  %s1949_s12 = smov [#allocation11]  }
  0x1c   : > { %s2681_s8 = scalar_select %p2071_p11, 1, 0 }
  0x1d   : > { %p1457_p12 = pneg %p2071_p11  ;;  %s181_s13 = sshll.u32 %s1949_s12, 4  ;;  %s2083_s13 = int_to_ptr.vmem [resolvable:$true] %s181_s13 }
  0x1e   : > { %s2683_s1 = sld [smem:[#allocation20_spill]] }
  0x1f   : > { %p2079_p13 = pnand %p1457_p12, %p2046_p1 }
  0x21   : > { %p1736_p2 = pneg %p2079_p13 }
  0x24   : > { %s1734_s16 = scalar_lea.hbm %s2683_s1, 640 }
  0x25   : > { %p1735_p0 = scmp.ne.s32.totalorder %s2683_s1, %s1734_s16  ;;  %p1741_p6 = scmp.lt.u32.totalorder %s1734_s16, %s2683_s1 }
  0x27   : > { %p1737_p4 = pnand %p1736_p2, %p1735_p0 }
  0x29   : > { %p1738_p5 = pneg %p1737_p4 }
  0x2b   : > { %p1743_p8 = pnand %p1741_p6, %p1738_p5 }
  0x2d   : > { %1746 = shalt.err (!%p1743_p8)
}
  0x2e   : > { %s1747_s12 = scalar_lea.vmem %s169_s10, 640  ;;  %p1755_p7 = scmp.lt.s32.totalorder %s169_s10, %s169_s10 }
  0x2f   : > { %p1748_p10 = scmp.ne.s32.totalorder %s169_s10, %s1747_s12  ;;  %p1756_p1 = scmp.lt.s32.totalorder %s1747_s12, %s1747_s12 }
  0x31   : > { %p1750_p12 = pnand %p1748_p10, %p1736_p2  ;;  %p1757_p3 = por %p1756_p1, %p1755_p7 }
  0x33   : > { %p1751_p9 = pneg %p1750_p12 }
  0x35   : > { %p1758_p11 = pnand %p1757_p3, %p1751_p9 }
  0x37   : > { %1761 = shalt.err (!%p1758_p11)
}
  0x38   : > { %s1950_s14 = smov 64   ;;  %s1951_s15 = smov 4  }
  0x39   : > { %1460 = dma.hbm_to_vmem [thread:$0]  (!%p2079_p13), %s2683_s1, 640, %s169_s10, [#allocation10], %s1950_s14, %s1950_s14, %s1951_s15  }
  0x3a   : > { %s2684_s2 = sld [smem:[#allocation21_spill]] }
  0x40   : > { %s1762_s9 = scalar_lea.hbm %s2684_s2, 1280 }
  0x41   : > { %p1763_p0 = scmp.ne.s32.totalorder %s2684_s2, %s1762_s9  ;;  %p1769_p7 = scmp.lt.u32.totalorder %s1762_s9, %s2684_s2 }
  0x43   : > { %p1765_p1 = pnand %p1763_p0, %p1736_p2 }
  0x45   : > { %p1766_p3 = pneg %p1765_p1 }
  0x47   : > { %p1771_p9 = pnand %p1769_p7, %p1766_p3 }
  0x49   : > { %1774 = shalt.err (!%p1771_p9)
}
  0x4a   : > { %s1775_s10 = scalar_lea.vmem %s2083_s13, 1280  ;;  %p1783_p6 = scmp.lt.s32.totalorder %s2083_s13, %s2083_s13 }
  0x4b   : > { %p1776_p11 = scmp.ne.s32.totalorder %s2083_s13, %s1775_s10  ;;  %p1784_p8 = scmp.lt.s32.totalorder %s1775_s10, %s1775_s10 }
  0x4d   : > { %p1778_p4 = pnand %p1776_p11, %p1736_p2  ;;  %p1785_p10 = por %p1784_p8, %p1783_p6 }
  0x4f   : > { %p1779_p5 = pneg %p1778_p4 }
  0x51   : > { %p1786_p12 = pnand %p1785_p10, %p1779_p5 }
  0x53   : > { %1789 = shalt.err (!%p1786_p12)
}
  0x54   : > { %s1952_s17 = smov 128   ;;  %s1953_s30 = smov 8  }
  0x55   : > { %1463 = dma.hbm_to_vmem [thread:$0]  (!%p2079_p13), %s2684_s2, 1280, %s2083_s13, [#allocation10], %s1952_s17, %s1952_s17, %s1953_s30  }
  0x56   : > { %s31_s15 = sadd.s32 1, %s1938_s24  ;;  %s34_s16 = sadd.s32 1, %s1942_s25 }
  0x57   : > { %p32_p2 = scmp.ge.s32.totalorder %s31_s15, 2  ;;  %s41_s20 = sadd.s32 1, %s1926_s22 }
  0x58   : > { %p48_p0 = scmp.ne.s32.totalorder %s1926_s22, %s1922_s21  ;;  %p49_p1 = scmp.eq.s32.totalorder %s1946_s26, 0 }
  0x59   : > { %s2707_s15 = smov (%p32_p2, %s31_s15), 0  ;;  %s2709_s16 = smov (!%p32_p2, %s34_s16), %s1942_s25 }
  0x5a   : > { %2685 = sst [smem:[#allocation19_spill]] %s2707_s15  ;;  %p2141_p3 = por %p49_p1, %p48_p0 }
  0x5b   : > { %s128_s27 = ssub.s32 %s1938_s24, %s2707_s15  ;;  %p36_p13 = scmp.ge.s32.totalorder %s2709_s16, 2 }
  0x5c   : > { %p1474_p7 = scmp.lt.s32.totalorder %s1946_s26, 4  ;;  %s198_s13 = sand.u32 1, %s1926_s22  }
  0x5d   : > { %s1343_s28 = sshll.u32 %s1942_s25, 11  ;;  %s2711_s16 = smov (%p36_p13, %s2709_s16), 0 }
  0x5e   : > { %s1299_s9 = sshll.u32 %s198_s13, 7  ;;  %s38_s12 = ssub.s32 %s1942_s25, %s2711_s16 }
  0x5f   : > { %p39_p9 = scmp.eq.s32.totalorder %s38_s12, 0  ;;  %s129_s10 = sor.u32 %s128_s27, %s38_s12 }
  0x60   : > { %p130_p11 = scmp.eq.s32.totalorder %s129_s10, 0  ;;  %s2157_s7 = scalar_lea.hbm %s2658_s0, %s1343_s28 }
  0x61   : > { %s2160_s14 = scalar_select %p39_p9, %s1926_s22, %s41_s20  }
  0x62   : > { %s2687_s1 = sadd.s32 1, %s1914_s19  ;;  %s202_s15 = scalar_lea.vmem [#allocation6], %s1299_s9 }
  0x63   : > { %s2165_s2 = scalar_select %p130_p11, %s1914_s19, %s2687_s1  }
  0x64   : > { %s209_s24 = sshll.u32 %s202_s15, 4  ;;  %p2171_p4 = pnand %p1474_p7, %p2141_p3  ;;  %s2175_s24 = int_to_ptr.vmem [resolvable:$true] %s209_s24 }
  0x65   : > { %s2177_s28 = scalar_lea.sflag [#allocation7], %s198_s13  ;;  %s1790_s20 = scalar_lea.hbm %s2157_s7, 2048 }
  0x66   : > { %p1791_p5 = scmp.ne.s32.totalorder %s2157_s7, %s1790_s20  ;;  %p1792_p6 = pneg %p2171_p4 }
  0x67   : > { %s1795_s11 = scalar_lea.hbm %s2658_s0, 4096  ;;  %p1796_p12 = scmp.lt.u32.totalorder %s2157_s7, %s2658_s0 }
  0x68   : > { %p1793_p8 = pnand %p1792_p6, %p1791_p5  ;;  %p1797_p2 = scmp.lt.u32.totalorder %s1795_s11, %s1790_s20 }
  0x69   : > { %p1799_p1 = scmp.lt.u32.totalorder %s1790_s20, %s2157_s7 }
  0x6a   : > { %p1794_p10 = pneg %p1793_p8  ;;  %p1798_p0 = por %p1797_p2, %p1796_p12 }
  0x6c   : > { %p1800_p3 = por %p1799_p1, %p1798_p0 }
  0x6e   : > { %p1801_p13 = pnand %p1800_p3, %p1794_p10 }
  0x70   : > { %1804 = shalt.err (!%p1801_p13)
}
  0x71   : > { %s1805_s13 = scalar_lea.vmem %s2175_s24, 2048  ;;  %s1954_s10 = smov [#allocation6]  }
  0x72   : > { %p1806_p7 = scmp.ne.s32.totalorder %s2175_s24, %s1805_s13  ;;  %s1810_s17 = sshll.u32 %s1954_s10, 4  ;;  %s1811_s17 = int_to_ptr.vmem [resolvable:$false] %s1810_s17 }
  0x73   : > { %s1812_s30 = scalar_lea.vmem %s1811_s17, 4096  ;;  %p1813_p5 = scmp.lt.s32.totalorder %s2175_s24, %s1811_s17 }
  0x74   : > { %p1808_p9 = pnand %p1806_p7, %p1792_p6  ;;  %p1814_p8 = scmp.lt.s32.totalorder %s1812_s30, %s1805_s13 }
  0x76   : > { %p1809_p11 = pneg %p1808_p9  ;;  %p1815_p12 = por %p1814_p8, %p1813_p5 }
  0x78   : > { %p1816_p2 = pnand %p1815_p12, %p1809_p11 }
  0x7a   : > { %1819 = shalt.err (!%p1816_p2)
}
  0x7b   : > { %s1955_s20 = smov 256   ;;  %s1956_s1 = smov 16  }
  0x7c   : > { %1467 = dma.hbm_to_vmem [thread:$0]  (!%p2171_p4), %s2157_s7, 2048, %s2175_s24, %s2177_s28, %s1955_s20, %s1955_s20, %s1956_s1  }
  0x7d   : > { %p2689_p6 = scmp.ne.s32.totalorder %s2681_s8, 0 }
  0x7e   : > { %s223_s15 = sand.u32 (!%p2689_p6), 1, %s1922_s21   ;;  %p2690_p10 = scmp.ne.s32.totalorder (!%p2689_p6), %s2677_s5, 0 }
  0x7f   : > { %221 = sbr.rel (%p2689_p6) target bundleno = 1273 (0x4f9), region = 36  ;;  %s1303_s11 = sshll.u32 (!%p2689_p6), %s223_s15, 7 }
  0x80   : > { %s224_s9 = scalar_lea.sflag (!%p2689_p6), [#allocation7], %s223_s15  ;;  %s2208_s12 = scalar_lea.vmem (!%p2689_p6), [#allocation6], %s1303_s11 }
  0x86   : > { %1893 = dma.done.wait (%p2690_p10), %s224_s9, 2048  }
  0x87   : > { %1895 = vsyncadd (%p2690_p10), %s224_s9, 4294965248  ;;  %p2691_p0 = scmp.ne.s32.totalorder %s2676_s29, 0 }
  0x89   : > { %1897 = dma.done.wait (%p2691_p0), [#allocation10], 1920  }
  0x8a   : > { %1899 = vsyncadd (%p2691_p0), [#allocation10], 4294965376  ;;  %s257_s24 = sand.u32 1, %s1910_s18   ;;  %p1307_p4 = scmp.ne.s32.totalorder %s1930_s23, 0 }
  0x8b   : > { %s1306_s8 = sshll.u32 %s257_s24, 6  ;;  %v266_v0 = vld [vmem:[%s2208_s12 + $0x8] sm:$0xff] (!%p1307_p4)  ;;  %v268_v1 = vld [vmem:[%s2208_s12 + $0x18] sm:$0xff] (!%p1307_p4)  ;;  %v265_v2 = vld [vmem:[%s2208_s12] sm:$0xff] (!%p1307_p4)  ;;  %v1957_v7 = vmov (!%p1307_p4), 0   ;;  %vm384_vm0 = vcmask (!%p1307_p4), 523264  }
  0x8c   : > { %s2221_s7 = scalar_lea.vmem [#allocation12], %s1306_s8  ;;  %264 = sbr.rel (%p1307_p4) target bundleno = 571 (0x23b), region = 52  ;;  %v282_v3 = vpack.c.bf16 (!%p1307_p4), %v268_v1, %v266_v0  ;;  %v267_v4 = vld [vmem:[%s2208_s12 + $0x10] sm:$0xff] (!%p1307_p4)  ;;  %v270_v5 = vld [vmem:[%s2208_s12 + $0x28] sm:$0xff] (!%p1307_p4)  ;;  %v272_v6 = vld [vmem:[%s2208_s12 + $0x38] sm:$0xff] (!%p1307_p4)  ;;  %432 = vmatprep.mubr.bf16.mxu0 (!%p1307_p4), %v1957_v7  ;;  %462 = vmatprep.mubr.bf16.mxu1 (!%p1307_p4), %v1957_v7  ;;  %vm572_vm1 = vcmask (!%p1307_p4), 64512  }
  0x8d   : > { %v281_v8 = vpack.c.bf16 (!%p1307_p4), %v267_v4, %v265_v2  ;;  %v284_v9 = vpack.c.bf16 (!%p1307_p4), %v272_v6, %v270_v5  ;;  %v269_v10 = vld [vmem:[%s2208_s12 + $0x20] sm:$0xff] (!%p1307_p4)  ;;  %v271_v11 = vld [vmem:[%s2208_s12 + $0x30] sm:$0xff] (!%p1307_p4)  ;;  %v274_v12 = vld [vmem:[%s2208_s12 + $0x48] sm:$0xff] (!%p1307_p4)  ;;  %1579 = vset.pattern.permute.xlu0 (!%p1307_p4), %v1957_v7  ;;  %1580 = vset.pattern.permute.xlu1 (!%p1307_p4), %v1957_v7 }
  0x8e   : > { %400 = vmatprep.subr.bf16.mxu0 (!%p1307_p4), %v282_v3  ;;  %1436 = vmatprep.subr.bf16.mxu1 (!%p1307_p4), %v282_v3  ;;  %v276_v13 = vld [vmem:[%s2208_s12 + $0x58] sm:$0xff] (!%p1307_p4)  ;;  %v283_v14 = vpack.c.bf16 (!%p1307_p4), %v271_v11, %v269_v10  ;;  %v273_v15 = vld [vmem:[%s2208_s12 + $0x40] sm:$0xff] (!%p1307_p4)  ;;  %v275_v16 = vld [vmem:[%s2208_s12 + $0x50] sm:$0xff] (!%p1307_p4) }
  0x8f   : > { %401 = vmatpush1.bf16.msra.mxu0 (!%p1307_p4), %v281_v8  ;;  %1440 = vmatpush1.bf16.msra.mxu1 (!%p1307_p4), %v281_v8  ;;  %v286_v17 = vpack.c.bf16 (!%p1307_p4), %v276_v13, %v274_v12  ;;  %v278_v18 = vld [vmem:[%s2208_s12 + $0x68] sm:$0xff] (!%p1307_p4)  ;;  %v280_v19 = vld [vmem:[%s2208_s12 + $0x78] sm:$0xff] (!%p1307_p4)  ;;  %v285_v20 = vpack.c.bf16 (!%p1307_p4), %v275_v16, %v273_v15  ;;  %v277_v21 = vld [vmem:[%s2208_s12 + $0x60] sm:$0xff] (!%p1307_p4) }
  0x90   : > { %402 = vmatprep.subr.bf16.mxu0 (!%p1307_p4), %v284_v9  ;;  %1437 = vmatprep.subr.bf16.mxu1 (!%p1307_p4), %v284_v9  ;;  %v288_v22 = vpack.c.bf16 (!%p1307_p4), %v280_v19, %v278_v18  ;;  %v279_v23 = vld [vmem:[%s2208_s12 + $0x70] sm:$0xff] (!%p1307_p4)  ;;  %v301_v25 = vld [vmem:[#allocation11 + $0x10] sm:$0xff] (!%p1307_p4)  ;;  %v299_v27 = vld [vmem:[#allocation11] sm:$0xff] (!%p1307_p4) }
  0x91   : > { %v300_v24 = vld [vmem:[#allocation11 + $0x8] sm:$0xff] (!%p1307_p4)  ;;  %321 = vperm.xlu1 (!%p1307_p4), %1580, %v301_v25   ;;  %v287_v26 = vpack.c.bf16 (!%p1307_p4), %v279_v23, %v277_v21  ;;  %v302_v28 = vld [vmem:[#allocation11 + $0x18] sm:$0xff] (!%p1307_p4)  ;;  %v1664_v30 = vld [vmem:[#allocation9 + $0x18] sm:$0xff] (!%p1307_p4)  }
  0x92   : > { %316 = vperm.xlu0 (!%p1307_p4), %1579, %v300_v24   ;;  %v1663_v29 = vld [vmem:[#allocation9] sm:$0xff] (!%p1307_p4)   ;;  %v303_v31 = vld [vmem:[#allocation11 + $0x20] sm:$0xff] (!%p1307_p4)  ;;  %v304_v32 = vld [vmem:[#allocation11 + $0x28] sm:$0xff] (!%p1307_p4) }
  0x93   : > { %403 = vmatpush1.bf16.msra.mxu0 %v283_v14  ;;  %1441 = vmatpush1.bf16.msra.mxu1 %v283_v14  ;;  %v305_v33 = vld [vmem:[#allocation11 + $0x30] sm:$0xff]  ;;  %v306_v34 = vld [vmem:[#allocation11 + $0x38] sm:$0xff]  ;;  %v1665_v35 = vld [vmem:[#allocation9 + $0x8] sm:$0xff]  }
  0x94   : > { %404 = vmatprep.subr.bf16.mxu0 %v286_v17  ;;  %1438 = vmatprep.subr.bf16.mxu1 %v286_v17  ;;  %v1666_v36 = vld [vmem:[#allocation9 + $0x20] sm:$0xff]   ;;  %v307_v37 = vld [vmem:[#allocation11 + $0x40] sm:$0xff]  ;;  %v308_v38 = vld [vmem:[#allocation11 + $0x48] sm:$0xff] }
  0x95   : > { %326 = vperm.xlu1 %1580, %v302_v28   ;;  %v1667_v39 = vld [vmem:[#allocation9 + $0x10] sm:$0xff]  }
  0x96   : > { %311 = vperm.xlu0 %1579, %v299_v27  }
  0x97   : > { %405 = vmatpush1.bf16.msra.mxu0 %v285_v20  ;;  %1442 = vmatpush1.bf16.msra.mxu1 %v285_v20 }
  0x98   : > { %406 = vmatprep.subr.bf16.mxu0 %v288_v22  ;;  %1439 = vmatprep.subr.bf16.mxu1 %v288_v22 }
  0x99   : > { %336 = vperm.xlu1 %1580, %v304_v32  }
  0x9a   : > { %331 = vperm.xlu0 %1579, %v303_v31  }
  0x9b   : > { %407 = vmatpush1.bf16.msra.mxu0 %v287_v26  ;;  %1443 = vmatpush1.bf16.msra.mxu1 %v287_v26 }
  0x9d   : > { %346 = vperm.xlu1 %1580, %v306_v34  }
  0x9e   : > { %1313 = vmatmul.mubr.msk.bf16.vlgmr.msra.gmra.mrb[0].mxu0 %vm384_vm0, %v1663_v29  ;;  %1316 = vmatmul.mubr.msk.bf16.vlgmr.msra.gmra.mrb[0].mxu1 %vm384_vm0, %v1664_v30 }
  0x9f   : > { %442 = vmatprep.mubr.bf16.mxu0 %v1957_v7  ;;  %472 = vmatprep.mubr.bf16.mxu1 %v1957_v7 }
  0xa0   : > { %341 = vperm.xlu0 %1579, %v305_v33  }
  0xa1   : > { %356 = vperm.xlu1 %1580, %v308_v38  }
  0xa4   : > { %351 = vperm.xlu0 %1579, %v307_v37  }
  0xa6   : > { %1314 = vmatmul.mubr.msk.bf16.gmra.mrb[4].mxu0 %vm384_vm0, %v1665_v35  ;;  %1317 = vmatmul.mubr.msk.bf16.gmra.mrb[4].mxu1 %vm384_vm0, %v1666_v36 }
  0xa7   : > { %452 = vmatprep.mubr.bf16.mxu0 %v1957_v7 }
  0xae   : > { %1315 = vmatmul.mubr.msk.bf16.gmra.mrb[8].mxu0 %vm384_vm0, %v1667_v39 }
 0x110   : > { %v322_v41 = vpop.permute.xlu1 %321 }
 0x111   : > { %v317_v40 = vpop.permute.xlu0 %316 }
 0x114   : > { %v327_v43 = vpop.permute.xlu1 %326 }
 0x115   : > { %v312_v42 = vpop.permute.xlu0 %311 }
 0x118   : > { %v337_v45 = vpop.permute.xlu1 %336 }
 0x119   : > { %v332_v44 = vpop.permute.xlu0 %331 }
 0x11c   : > { %v347_v47 = vpop.permute.xlu1 %346 }
 0x11f   : > { %v342_v46 = vpop.permute.xlu0 %341 }
 0x120   : > { %v357_v5 = vpop.permute.xlu1 %356 }
 0x123   : > { %v352_v4 = vpop.permute.xlu0 %351 }
 0x171   : > { %v434_v48 = vpop.f32.mrb[0].mxu0  ;;  %v464_v49 = vpop.f32.mrb[0].mxu1 }
 0x172   : > { %v435_v50 = vadd.f32 %v434_v48, %v312_v42  ;;  %v465_v51 = vadd.f32 %v464_v49, %v342_v46  ;;  %v436_v52 = vpop.f32.mrb[1].mxu0  ;;  %v466_v53 = vpop.f32.mrb[1].mxu1 }
 0x173   : > { %v437_v54 = vadd.f32 %v436_v52, %v312_v42  ;;  %v467_v55 = vadd.f32 %v466_v53, %v342_v46  ;;  %v438_v56 = vpop.f32.mrb[2].mxu0  ;;  %v468_v57 = vpop.f32.mrb[2].mxu1 }
 0x174   : > { %v439_v58 = vadd.f32 %v438_v56, %v317_v40  ;;  %v469_v59 = vadd.f32 %v468_v57, %v347_v47  ;;  %v440_v60 = vpop.f32.mrb[3].mxu0  ;;  %v470_v61 = vpop.f32.mrb[3].mxu1 }
 0x175   : > { %v1344_v62 = vpack.c.bf16 %v437_v54, %v435_v50  ;;  %v441_v63 = vadd.f32 %v440_v60, %v317_v40  ;;  %v471_v0 = vadd.f32 %v470_v61, %v347_v47 }
 0x176   : > { %v593_v1 = vpack.c.bf16 %v469_v59, %v465_v51 }
 0x177   : > { %491 = vst [vmem:[#allocation2] sm:$0xff] %v1344_v62  ;;  %v1581_v2 = vpack.i.bf16 %v441_v63, %v439_v58  ;;  %v594_v3 = vpack.c.bf16 %v471_v0, %v467_v55 }
 0x178   : > { %601 = vst [vmem:[#allocation4 + $0x20] sm:$0xff] %v593_v1 }
 0x179   : > { %602 = vst [vmem:[#allocation4 + $0x28] sm:$0xff] %v594_v3  ;;  %v474_v6 = vpop.f32.mrb[4].mxu1  ;;  %1582 = vxpose.xlu0.b32.start.end [1/1] (short) %v1581_v2, 128  ;;  %v444_v7 = vpop.f32.mrb[4].mxu0 }
 0x17a   : > { %v476_v8 = vpop.f32.mrb[5].mxu1  ;;  %v445_v9 = vadd.f32 %v444_v7, %v322_v41  ;;  %v446_v10 = vpop.f32.mrb[5].mxu0  ;;  %v475_v14 = vadd.f32 %v474_v6, %v352_v4 }
 0x17b   : > { %v478_v11 = vpop.f32.mrb[6].mxu1  ;;  %v447_v12 = vadd.f32 %v446_v10, %v322_v41  ;;  %v448_v13 = vpop.f32.mrb[6].mxu0  ;;  %v477_v19 = vadd.f32 %v476_v8, %v352_v4 }
 0x17c   : > { %v479_v15 = vadd.f32 %v478_v11, %v357_v5  ;;  %v480_v16 = vpop.f32.mrb[7].mxu1  ;;  %v449_v17 = vadd.f32 %v448_v13, %v327_v43  ;;  %v450_v18 = vpop.f32.mrb[7].mxu0 }
 0x17d   : > { %v481_v20 = vadd.f32 %v480_v16, %v357_v5  ;;  %v451_v21 = vadd.f32 %v450_v18, %v327_v43 }
 0x17e   : > { %v595_v22 = vpack.c.bf16 %v479_v15, %v475_v14  ;;  %v589_v23 = vpack.c.bf16 %v449_v17, %v445_v9 }
 0x17f   : > { %v596_v24 = vpack.c.bf16 %v481_v20, %v477_v19  ;;  %v590_v25 = vpack.c.bf16 %v451_v21, %v447_v12 }
 0x180   : > { %603 = vst [vmem:[#allocation4 + $0x30] sm:$0xff] %v595_v22  ;;  %597 = vst [vmem:[#allocation4] sm:$0xff] %v589_v23 }
 0x181   : > { %604 = vst [vmem:[#allocation4 + $0x38] sm:$0xff] %v596_v24  ;;  %598 = vst [vmem:[#allocation4 + $0x8] sm:$0xff] %v590_v25  ;;  %v454_v26 = vpop.f32.mrb[8].mxu0 }
 0x182   : > { %v456_v27 = vpop.f32.mrb[9].mxu0  ;;  %v455_v29 = vadd.f32 %v454_v26, %v332_v44 }
 0x183   : > { %v458_v28 = vpop.f32.mrb[10].mxu0  ;;  %v457_v32 = vadd.f32 %v456_v27, %v332_v44 }
 0x184   : > { %v459_v30 = vadd.f32 %v458_v28, %v337_v45  ;;  %v460_v31 = vpop.f32.mrb[11].mxu0 }
 0x185   : > { %v461_v33 = vadd.f32 %v460_v31, %v337_v45 }
 0x186   : > { %v591_v34 = vpack.c.bf16 %v459_v30, %v455_v29 }
 0x187   : > { %v592_v35 = vpack.c.bf16 %v461_v33, %v457_v32 }
 0x188   : > { %599 = vst [vmem:[#allocation4 + $0x10] sm:$0xff] %v591_v34 }
 0x189   : > { %600 = vst [vmem:[#allocation4 + $0x18] sm:$0xff] %v592_v35 }
 0x1f9   : > { %v1583_v36 = vpop.trf.xlu0 }
 0x1fa   : > { %v1587_v37 = vunpack.i.h.bf16 %v1583_v36  ;;  %v1584_v38 = vunpack.i.l.bf16 %v1583_v36 }
 0x1fd   : > { %v1588_v39 = vpop.trf.xlu0 }
 0x1fe   : > { %v1592_v40 = vunpack.i.h.bf16 %v1588_v39  ;;  %v1589_v41 = vunpack.i.l.bf16 %v1588_v39 }
 0x200   : > { %v556_v42 = vpack.c.bf16 %v1589_v41, %v1584_v38  ;;  %v564_v43 = vpack.c.bf16 %v1592_v40, %v1587_v37 }
 0x201   : > { %v1593_v46 = vpop.trf.xlu0 }
 0x202   : > { %573 = vst.msk [vmem:[#allocation3] sm:$0xff] %vm572_vm1, %v556_v42  ;;  %581 = vst.msk [vmem:[#allocation3 + $0x40] sm:$0xff] %vm572_vm1, %v564_v43  ;;  %v1597_v44 = vunpack.i.h.bf16 %v1593_v46  ;;  %v1594_v45 = vunpack.i.l.bf16 %v1593_v46 }
 0x205   : > { %v1598_v47 = vpop.trf.xlu0 }
 0x206   : > { %v1602_v48 = vunpack.i.h.bf16 %v1598_v47  ;;  %v1599_v49 = vunpack.i.l.bf16 %v1598_v47 }
 0x208   : > { %v557_v50 = vpack.c.bf16 %v1599_v49, %v1594_v45  ;;  %v565_v51 = vpack.c.bf16 %v1602_v48, %v1597_v44 }
 0x209   : > { %v1603_v52 = vpop.trf.xlu0 }
 0x20a   : > { %574 = vst.msk [vmem:[#allocation3 + $0x8] sm:$0xff] %vm572_vm1, %v557_v50  ;;  %582 = vst.msk [vmem:[#allocation3 + $0x48] sm:$0xff] %vm572_vm1, %v565_v51  ;;  %v1607_v53 = vunpack.i.h.bf16 %v1603_v52  ;;  %v1604_v54 = vunpack.i.l.bf16 %v1603_v52 }
 0x20d   : > { %v1608_v55 = vpop.trf.xlu0 }
 0x20e   : > { %v1612_v56 = vunpack.i.h.bf16 %v1608_v55  ;;  %v1609_v57 = vunpack.i.l.bf16 %v1608_v55 }
 0x210   : > { %v558_v58 = vpack.c.bf16 %v1609_v57, %v1604_v54  ;;  %v566_v59 = vpack.c.bf16 %v1612_v56, %v1607_v53 }
 0x211   : > { %v1613_v60 = vpop.trf.xlu0 }
 0x212   : > { %575 = vst.msk [vmem:[#allocation3 + $0x10] sm:$0xff] %vm572_vm1, %v558_v58  ;;  %583 = vst.msk [vmem:[#allocation3 + $0x50] sm:$0xff] %vm572_vm1, %v566_v59  ;;  %v1617_v61 = vunpack.i.h.bf16 %v1613_v60  ;;  %v1614_v62 = vunpack.i.l.bf16 %v1613_v60 }
 0x215   : > { %v1618_v63 = vpop.trf.xlu0 }
 0x216   : > { %v1622_v0 = vunpack.i.h.bf16 %v1618_v63  ;;  %v1619_v1 = vunpack.i.l.bf16 %v1618_v63 }
 0x218   : > { %v559_v2 = vpack.c.bf16 %v1619_v1, %v1614_v62  ;;  %v567_v3 = vpack.c.bf16 %v1622_v0, %v1617_v61 }
 0x219   : > { %v1623_v4 = vpop.trf.xlu0 }
 0x21a   : > { %576 = vst.msk [vmem:[#allocation3 + $0x18] sm:$0xff] %vm572_vm1, %v559_v2  ;;  %584 = vst.msk [vmem:[#allocation3 + $0x58] sm:$0xff] %vm572_vm1, %v567_v3  ;;  %v1627_v5 = vunpack.i.h.bf16 %v1623_v4  ;;  %v1624_v6 = vunpack.i.l.bf16 %v1623_v4 }
 0x21d   : > { %v1628_v7 = vpop.trf.xlu0 }
 0x21e   : > { %v1632_v8 = vunpack.i.h.bf16 %v1628_v7  ;;  %v1629_v9 = vunpack.i.l.bf16 %v1628_v7 }
 0x220   : > { %v560_v10 = vpack.c.bf16 %v1629_v9, %v1624_v6  ;;  %v568_v11 = vpack.c.bf16 %v1632_v8, %v1627_v5 }
 0x221   : > { %v1633_v12 = vpop.trf.xlu0 }
 0x222   : > { %577 = vst.msk [vmem:[#allocation3 + $0x20] sm:$0xff] %vm572_vm1, %v560_v10  ;;  %585 = vst.msk [vmem:[#allocation3 + $0x60] sm:$0xff] %vm572_vm1, %v568_v11  ;;  %v1637_v13 = vunpack.i.h.bf16 %v1633_v12  ;;  %v1634_v14 = vunpack.i.l.bf16 %v1633_v12 }
 0x225   : > { %v1638_v15 = vpop.trf.xlu0 }
 0x226   : > { %v1642_v16 = vunpack.i.h.bf16 %v1638_v15  ;;  %v1639_v17 = vunpack.i.l.bf16 %v1638_v15 }
 0x228   : > { %v561_v18 = vpack.c.bf16 %v1639_v17, %v1634_v14  ;;  %v569_v19 = vpack.c.bf16 %v1642_v16, %v1637_v13 }
 0x229   : > { %v1643_v20 = vpop.trf.xlu0 }
 0x22a   : > { %578 = vst.msk [vmem:[#allocation3 + $0x28] sm:$0xff] %vm572_vm1, %v561_v18  ;;  %586 = vst.msk [vmem:[#allocation3 + $0x68] sm:$0xff] %vm572_vm1, %v569_v19  ;;  %v1647_v21 = vunpack.i.h.bf16 %v1643_v20  ;;  %v1644_v22 = vunpack.i.l.bf16 %v1643_v20 }
 0x22d   : > { %v1648_v23 = vpop.trf.xlu0 }
 0x22e   : > { %v1652_v24 = vunpack.i.h.bf16 %v1648_v23  ;;  %v1649_v25 = vunpack.i.l.bf16 %v1648_v23 }
 0x230   : > { %v562_v26 = vpack.c.bf16 %v1649_v25, %v1644_v22  ;;  %v570_v27 = vpack.c.bf16 %v1652_v24, %v1647_v21 }
 0x231   : > { %v1653_v28 = vpop.trf.xlu0 }
 0x232   : > { %579 = vst.msk [vmem:[#allocation3 + $0x30] sm:$0xff] %vm572_vm1, %v562_v26  ;;  %587 = vst.msk [vmem:[#allocation3 + $0x70] sm:$0xff] %vm572_vm1, %v570_v27  ;;  %v1657_v29 = vunpack.i.h.bf16 %v1653_v28  ;;  %v1654_v30 = vunpack.i.l.bf16 %v1653_v28 }
 0x235   : > { %v1658_v31 = vpop.trf.xlu0 }
 0x236   : > { %v1662_v32 = vunpack.i.h.bf16 %v1658_v31  ;;  %v1659_v33 = vunpack.i.l.bf16 %v1658_v31 }
 0x238   : > { %v563_v34 = vpack.c.bf16 %v1659_v33, %v1654_v30  ;;  %v571_v35 = vpack.c.bf16 %v1662_v32, %v1657_v29 }
 0x23a   : > { %580 = vst.msk [vmem:[#allocation3 + $0x38] sm:$0xff] %vm572_vm1, %v563_v34  ;;  %588 = vst.msk [vmem:[#allocation3 + $0x78] sm:$0xff] %vm572_vm1, %v571_v35 }
 0x23b PF: > { %s1319_s29 = sshll.u32 %s1930_s23, 7  ;;  %v611_v36 = vld [vmem:[#allocation3] sm:$0xff]  ;;  %vm627_vm2 = vcmask 64512   ;;  %vm676_vm3 = vcmask 1043456   ;;  %v612_v39 = vld [vmem:[#allocation3 + $0x8] sm:$0xff]  ;;  %v613_v40 = vld [vmem:[#allocation3 + $0x10] sm:$0xff] }
 0x23c   : > { %s2269_s5 = sshra.s32 %s1319_s29, 7  ;;  %1404 = vmatprep.mubr.msk.bf16.mxu0 %vm627_vm2, %v611_v36  ;;  %v614_v41 = vld [vmem:[#allocation3 + $0x18] sm:$0xff]  ;;  %v615_v42 = vld [vmem:[#allocation3 + $0x20] sm:$0xff]  ;;  %v616_v43 = vld [vmem:[#allocation3 + $0x28] sm:$0xff]  ;;  %s1143_s13 = sld [smem:[#allocation5]] }
 0x23d   : > { %s1320_s27 = sshll.u32 %s2269_s5, 2  ;;  %v617_v46 = vld [vmem:[#allocation3 + $0x30] sm:$0xff]  ;;  %v619_v45 = vld [vmem:[#allocation3 + $0x40] sm:$0xff]  ;;  %v620_v47 = vld [vmem:[#allocation3 + $0x48] sm:$0xff]  ;;  %s1337_s10 = sshll.u32 %s2269_s5, 3 }
 0x23e   : > { %s609_s28 = scalar_lea.vmem [#allocation2], %s1320_s27  ;;  %v621_v48 = vld [vmem:[#allocation3 + $0x50] sm:$0xff]  ;;  %v622_v49 = vld [vmem:[#allocation3 + $0x58] sm:$0xff]  ;;  %v623_v50 = vld [vmem:[#allocation3 + $0x60] sm:$0xff]  ;;  %s2567_s17 = scalar_lea.vmem %s2208_s12, %s1337_s10 [#allocation6] }
 0x23f   : > { %v610_v37 = vld [vmem:[%s609_s28] sm:$0xf]  ;;  %v624_v51 = vld [vmem:[#allocation3 + $0x68] sm:$0xff]  ;;  %v625_v52 = vld [vmem:[#allocation3 + $0x70] sm:$0xff]  ;;  %s1339_s30 = sshll.u32 %s1934_s3, 4  ;;  %s1184_s1 = sshll.u32 %s2221_s7, 4  ;;  %s2586_s1 = int_to_ptr.vmem [resolvable:$true] %s1184_s1 }
 0x240   : > { %1444 = vmatprep.subr.msk.bf16.mxu0 %vm676_vm3, %v610_v37  ;;  %v678_v38 = vsel %vm676_vm3, %v610_v37, 0  ;;  %s1181_s20 = sadd.s32 %s1930_s23, %s1339_s30  ;;  %s2597_s9 = scalar_lea.sflag [#allocation8], %s257_s24 }
 0x241   : > { %1403 = vmatpush3.bf16.msra.mxu0 %v678_v38  ;;  %v618_v44 = vld [vmem:[#allocation3 + $0x38] sm:$0xff]  ;;  %s1340_s15 = sshll.u32 %s1181_s20, 7  ;;  %s1820_s12 = scalar_lea.vmem %s2586_s1, 1024 }
 0x242   : > { %v626_v53 = vld [vmem:[#allocation3 + $0x78] sm:$0xff]  ;;  %s2591_s23 = scalar_lea.hbm %s2662_s4, %s1340_s15  ;;  %p1821_p1 = scmp.ne.s32.totalorder %s2586_s1, %s1820_s12 }
 0x243   : > { %p2692_p3 = scmp.ne.s32.totalorder %s2678_s6, 0  ;;  %s1958_s8 = smov [#allocation12]  }
 0x244   : > { %1405 = vmatmul.mubr.msk.bf16.vlgmr.msra.gmra.mrb[0].mxu0 %vm627_vm2, %v612_v39  ;;  %s1824_s29 = sshll.u32 %s1958_s8, 4  ;;  %s1825_s29 = int_to_ptr.vmem [resolvable:$false] %s1824_s29 }
 0x245   : > { %1408 = vmatprep.mubr.msk.bf16.mxu0 %vm627_vm2, %v613_v40  ;;  %p1822_p13 = pnand %p1821_p1, %p2692_p3  ;;  %s1826_s5 = scalar_lea.vmem %s1825_s29, 2048 }
 0x246   : > { %p1827_p9 = scmp.lt.s32.totalorder %s2586_s1, %s1825_s29  ;;  %p1828_p11 = scmp.lt.s32.totalorder %s1826_s5, %s1820_s12 }
 0x247   : > { %p1823_p7 = pneg %p1822_p13 }
 0x248   : > { %p1829_p5 = por %p1828_p11, %p1827_p9 }
 0x24a   : > { %p1830_p8 = pnand %p1829_p5, %p1823_p7 }
 0x24c   : > { %1409 = vmatmul.mubr.msk.bf16.gmra.mrb[4].mxu0 %vm627_vm2, %v614_v41 }
 0x24d   : > { %1412 = vmatprep.mubr.msk.bf16.mxu0 %vm627_vm2, %v615_v42 }
 0x254   : > { %1413 = vmatmul.mubr.msk.bf16.gmra.mrb[8].mxu0 %vm627_vm2, %v616_v43 }
 0x255   : > { %1416 = vmatprep.mubr.msk.bf16.mxu0 %vm627_vm2, %v617_v46 }
 0x25c   : > { %1417 = vmatmul.mubr.msk.bf16.gmra.mrb[12].mxu0 %vm627_vm2, %v618_v44 }
 0x25d   : > { %1420 = vmatprep.mubr.msk.bf16.mxu0 %vm627_vm2, %v619_v45 }
 0x264   : > { %1421 = vmatmul.mubr.msk.bf16.gmra.mrb[16].mxu0 %vm627_vm2, %v620_v47 }
 0x265   : > { %1424 = vmatprep.mubr.msk.bf16.mxu0 %vm627_vm2, %v621_v48 }
 0x26c   : > { %1425 = vmatmul.mubr.msk.bf16.gmra.mrb[20].mxu0 %vm627_vm2, %v622_v49 }
 0x26d   : > { %1428 = vmatprep.mubr.msk.bf16.mxu0 %vm627_vm2, %v623_v50 }
 0x274   : > { %1429 = vmatmul.mubr.msk.bf16.gmra.mrb[24].mxu0 %vm627_vm2, %v624_v51 }
 0x275   : > { %1432 = vmatprep.mubr.msk.bf16.mxu0 %vm627_vm2, %v625_v52 }
 0x27c   : > { %1433 = vmatmul.mubr.msk.bf16.gmra.mrb[28].mxu0 %vm627_vm2, %v626_v53 }
 0x317   : > { %v2288_v54 = vpop.f32.mrb[0].mxu0 }
 0x318   : > { %v2290_v55 = vpop.f32.mrb[1].mxu0 }
 0x319   : > { %v2292_v56 = vpop.f32.mrb[2].mxu0 }
 0x31a   : > { %v2294_v57 = vpop.f32.mrb[3].mxu0 }
 0x31f   : > { %v2296_v58 = vpop.f32.mrb[4].mxu0 }
 0x320   : > { %v843_v59 = vmax.f32 %v2288_v54, %v2296_v58  ;;  %v2300_v60 = vpop.f32.mrb[5].mxu0 }
 0x321   : > { %v841_v61 = vmax.f32 %v2290_v55, %v2300_v60  ;;  %v2304_v62 = vpop.f32.mrb[6].mxu0 }
 0x322   : > { %v844_v63 = vmax.f32 %v2292_v56, %v2304_v62  ;;  %v2308_v0 = vpop.f32.mrb[7].mxu0 }
 0x323   : > { %v842_v1 = vmax.f32 %v2294_v57, %v2308_v0 }
 0x327   : > { %v2312_v2 = vpop.f32.mrb[8].mxu0 }
 0x328   : > { %v847_v3 = vmax.f32 %v843_v59, %v2312_v2  ;;  %v2315_v4 = vpop.f32.mrb[9].mxu0 }
 0x329   : > { %v845_v5 = vmax.f32 %v841_v61, %v2315_v4  ;;  %v2318_v6 = vpop.f32.mrb[10].mxu0 }
 0x32a   : > { %v848_v7 = vmax.f32 %v844_v63, %v2318_v6  ;;  %v2321_v8 = vpop.f32.mrb[11].mxu0 }
 0x32b   : > { %v846_v9 = vmax.f32 %v842_v1, %v2321_v8 }
 0x32f   : > { %v2324_v10 = vpop.f32.mrb[12].mxu0 }
 0x330   : > { %v851_v11 = vmax.f32 %v847_v3, %v2324_v10  ;;  %v2327_v12 = vpop.f32.mrb[13].mxu0 }
 0x331   : > { %v849_v13 = vmax.f32 %v845_v5, %v2327_v12  ;;  %v2330_v14 = vpop.f32.mrb[14].mxu0 }
 0x332   : > { %v852_v15 = vmax.f32 %v848_v7, %v2330_v14  ;;  %v2333_v16 = vpop.f32.mrb[15].mxu0 }
 0x333   : > { %v850_v17 = vmax.f32 %v846_v9, %v2333_v16 }
 0x337   : > { %v2336_v18 = vpop.f32.mrb[16].mxu0 }
 0x338   : > { %v855_v19 = vmax.f32 %v851_v11, %v2336_v18  ;;  %v2339_v20 = vpop.f32.mrb[17].mxu0 }
 0x339   : > { %v853_v21 = vmax.f32 %v849_v13, %v2339_v20  ;;  %v2342_v22 = vpop.f32.mrb[18].mxu0 }
 0x33a   : > { %v856_v23 = vmax.f32 %v852_v15, %v2342_v22  ;;  %v2345_v24 = vpop.f32.mrb[19].mxu0 }
 0x33b   : > { %v854_v25 = vmax.f32 %v850_v17, %v2345_v24 }
 0x33f   : > { %v2348_v26 = vpop.f32.mrb[20].mxu0 }
 0x340   : > { %v859_v27 = vmax.f32 %v855_v19, %v2348_v26  ;;  %v2351_v28 = vpop.f32.mrb[21].mxu0 }
 0x341   : > { %v857_v29 = vmax.f32 %v853_v21, %v2351_v28  ;;  %v2354_v30 = vpop.f32.mrb[22].mxu0 }
 0x342   : > { %v860_v31 = vmax.f32 %v856_v23, %v2354_v30  ;;  %v2357_v32 = vpop.f32.mrb[23].mxu0 }
 0x343   : > { %v858_v33 = vmax.f32 %v854_v25, %v2357_v32 }
 0x347   : > { %v2360_v34 = vpop.f32.mrb[24].mxu0 }
 0x348   : > { %v863_v35 = vmax.f32 %v859_v27, %v2360_v34  ;;  %v2363_v36 = vpop.f32.mrb[25].mxu0 }
 0x349   : > { %v861_v37 = vmax.f32 %v857_v29, %v2363_v36  ;;  %v2366_v38 = vpop.f32.mrb[26].mxu0 }
 0x34a   : > { %v864_v39 = vmax.f32 %v860_v31, %v2366_v38  ;;  %v2369_v40 = vpop.f32.mrb[27].mxu0 }
 0x34b   : > { %v862_v41 = vmax.f32 %v858_v33, %v2369_v40 }
 0x34f   : > { %v2372_v42 = vpop.f32.mrb[28].mxu0 }
 0x350   : > { %v867_v43 = vmax.f32 %v863_v35, %v2372_v42  ;;  %v2375_v46 = vpop.f32.mrb[29].mxu0 }
 0x351   : > { %v865_v44 = vmax.f32 %v861_v37, %v2375_v46  ;;  %v2378_v45 = vpop.f32.mrb[30].mxu0 }
 0x352   : > { %v868_v47 = vmax.f32 %v864_v39, %v2378_v45  ;;  %v2381_v48 = vpop.f32.mrb[31].mxu0 }
 0x353   : > { %v866_v49 = vmax.f32 %v862_v41, %v2381_v48 }
 0x354   : > { %v870_v50 = vmax.f32 %v867_v43, %v868_v47 }
 0x355   : > { %v869_v51 = vmax.f32 %v865_v44, %v866_v49 }
 0x357   : > { %v871_v52 = vmax.f32 %v869_v51, %v870_v50  ;;  %v1061_v51 = vld [vmem:[#allocation4 + $0x8] sm:$0xff] }
 0x358   : > { %1100 = vmatprep.mubr.bf16.mxu1 %v1061_v51 }
 0x359   : > { %v872_v53 = vrot.slane %v871_v52, 4 }
 0x35b   : > { %v873_v59 = vmax.f32 %v871_v52, %v872_v53 }
 0x35d   : > { %v874_v61 = vrot.slane %v873_v59, 2 }
 0x35f   : > { %v875_v63 = vmax.f32 %v873_v59, %v874_v61 }
 0x361   : > { %v876_v1 = vrot.slane %v875_v63, 1 }
 0x363   : > { %v2384_v3 = vmax.f32 %v875_v63, %v876_v1 }
 0x365   : > { %v878_v5 = vsub.f32 %v2290_v55, %v2384_v3  ;;  %v879_v7 = vsub.f32 %v2294_v57, %v2384_v3  ;;  %v880_v9 = vsub.f32 %v2288_v54, %v2384_v3  ;;  %v881_v11 = vsub.f32 %v2292_v56, %v2384_v3 }
 0x366   : > { %v882_v13 = vsub.f32 %v2300_v60, %v2384_v3  ;;  %v883_v15 = vsub.f32 %v2308_v0, %v2384_v3  ;;  %v884_v17 = vsub.f32 %v2296_v58, %v2384_v3  ;;  %v885_v55 = vsub.f32 %v2304_v62, %v2384_v3 }
 0x367   : > { %v886_v57 = vsub.f32 %v2315_v4, %v2384_v3  ;;  %v887_v54 = vsub.f32 %v2321_v8, %v2384_v3  ;;  %v888_v56 = vsub.f32 %v2312_v2, %v2384_v3  ;;  %v889_v60 = vsub.f32 %v2318_v6, %v2384_v3 }
 0x368   : > { %v890_v0 = vsub.f32 %v2327_v12, %v2384_v3  ;;  %v891_v58 = vsub.f32 %v2333_v16, %v2384_v3  ;;  %v892_v62 = vsub.f32 %v2324_v10, %v2384_v3  ;;  %v893_v4 = vsub.f32 %v2330_v14, %v2384_v3 }
 0x369   : > { %v894_v8 = vsub.f32 %v2339_v20, %v2384_v3  ;;  %v895_v2 = vsub.f32 %v2345_v24, %v2384_v3  ;;  %v896_v6 = vsub.f32 %v2336_v18, %v2384_v3  ;;  %v897_v12 = vsub.f32 %v2342_v22, %v2384_v3 }
 0x36a   : > { %v898_v16 = vsub.f32 %v2351_v28, %v2384_v3  ;;  %v899_v10 = vsub.f32 %v2357_v32, %v2384_v3  ;;  %v900_v19 = vsub.f32 %v2348_v26, %v2384_v3  ;;  %v901_v21 = vsub.f32 %v2354_v30, %v2384_v3 }
 0x36b   : > { %v902_v23 = vsub.f32 %v2363_v36, %v2384_v3  ;;  %v903_v25 = vsub.f32 %v2369_v40, %v2384_v3  ;;  %v904_v27 = vsub.f32 %v2360_v34, %v2384_v3  ;;  %v905_v29 = vsub.f32 %v2366_v38, %v2384_v3 }
 0x36c   : > { %v906_v31 = vsub.f32 %v2375_v46, %v2384_v3  ;;  %v907_v33 = vsub.f32 %v2381_v48, %v2384_v3  ;;  %v908_v35 = vsub.f32 %v2372_v42, %v2384_v3  ;;  %v909_v37 = vsub.f32 %v2378_v45, %v2384_v3 }
 0x36d   : > { %v910_v39 = vmul.f32 1.442695, %v878_v5  ;;  %v912_v41 = vmul.f32 1.442695, %v879_v7  ;;  %v914_v43 = vmul.f32 1.442695, %v880_v9 }
 0x36e   : > { %v916_v44 = vmul.f32 1.442695, %v881_v11  ;;  %v918_v47 = vmul.f32 1.442695, %v882_v13  ;;  %v920_v49 = vmul.f32 1.442695, %v883_v15 }
 0x36f   : > { %1668 = vpow2.f32 %v910_v39  ;;  %v922_v50 = vmul.f32 1.442695, %v884_v17  ;;  %v924_v52 = vmul.f32 1.442695, %v885_v55  ;;  %v926_v61 = vmul.f32 1.442695, %v886_v57 }
 0x370   : > { %1670 = vpow2.f32 %v912_v41  ;;  %v928_v5 = vmul.f32 1.442695, %v887_v54  ;;  %v930_v11 = vmul.f32 1.442695, %v888_v56  ;;  %v932_v17 = vmul.f32 1.442695, %v889_v60 }
 0x371   : > { %1672 = vpow2.f32 %v914_v43  ;;  %v934_v39 = vmul.f32 1.442695, %v890_v0  ;;  %v936_v43 = vmul.f32 1.442695, %v891_v58  ;;  %v940_v0 = vmul.f32 1.442695, %v893_v4 }
 0x372   : > { %1674 = vpow2.f32 %v916_v44  ;;  %v942_v58 = vmul.f32 1.442695, %v894_v8  ;;  %v960_v26 = vmul.f32 1.442695, %v903_v25  ;;  %v962_v30 = vmul.f32 1.442695, %v904_v27 }
 0x373   : > { %1676 = vpow2.f32 %v918_v47  ;;  %v938_v47 = vmul.f32 1.442695, %v892_v62  ;;  %v964_v36 = vmul.f32 1.442695, %v905_v29  ;;  %v966_v40 = vmul.f32 1.442695, %v906_v31 }
 0x374   : > { %1678 = vpow2.f32 %v920_v49  ;;  %v968_v34 = vmul.f32 1.442695, %v907_v33  ;;  %v970_v38 = vmul.f32 1.442695, %v908_v35  ;;  %v972_v46 = vmul.f32 1.442695, %v909_v37 }
 0x375   : > { %1680 = vpow2.f32 %v922_v50 }
 0x376   : > { %1682 = vpow2.f32 %v924_v52 }
 0x377   : > { %1684 = vpow2.f32 %v926_v61  ;;  %v944_v61 = vmul.f32 1.442695, %v895_v2 }
 0x378   : > { %1686 = vpow2.f32 %v928_v5  ;;  %v948_v5 = vmul.f32 1.442695, %v897_v12 }
 0x379   : > { %v2450_v53 = vpop.eup %1668  ;;  %1688 = vpow2.f32 %v930_v11  ;;  %v952_v11 = vmul.f32 1.442695, %v899_v10  ;;  %v958_v10 = vmul.f32 1.442695, %v902_v23 }
 0x37a   : > { %v2452_v59 = vpop.eup %1670  ;;  %1690 = vpow2.f32 %v932_v17  ;;  %v956_v17 = vmul.f32 1.442695, %v901_v21 }
 0x37b   : > { %v974_v63 = vadd.f32 %v2452_v59, %v2450_v53  ;;  %v2456_v1 = vpop.eup %1672  ;;  %1692 = vpow2.f32 %v934_v39 }
 0x37c   : > { %v2459_v9 = vpop.eup %1674  ;;  %1694 = vpow2.f32 %v936_v43 }
 0x37d   : > { %v975_v7 = vadd.f32 %v2456_v1, %v974_v63  ;;  %v2462_v15 = vpop.eup %1676  ;;  %1696 = vpow2.f32 %v938_v47  ;;  %v946_v63 = vmul.f32 1.442695, %v896_v6 }
 0x37e   : > { %v2465_v57 = vpop.eup %1678  ;;  %1698 = vpow2.f32 %v940_v0 }
 0x37f   : > { %v976_v13 = vadd.f32 %v2459_v9, %v975_v7  ;;  %v2468_v41 = vpop.eup %1680  ;;  %1700 = vpow2.f32 %v942_v58  ;;  %v950_v7 = vmul.f32 1.442695, %v898_v16 }
 0x380   : > { %v2471_v44 = vpop.eup %1682  ;;  %1702 = vpow2.f32 %v944_v61 }
 0x381   : > { %v977_v55 = vadd.f32 %v2462_v15, %v976_v13  ;;  %v2474_v49 = vpop.eup %1684  ;;  %1704 = vpow2.f32 %v946_v63  ;;  %v954_v13 = vmul.f32 1.442695, %v900_v19 }
 0x382   : > { %v2480_v51 = vpop.eup %1686  ;;  %1706 = vpow2.f32 %v948_v5 }
 0x383   : > { %v978_v54 = vadd.f32 %v2465_v57, %v977_v55  ;;  %v2486_v52 = vpop.eup %1688  ;;  %1708 = vpow2.f32 %v950_v7 }
 0x384   : > { %v2492_v4 = vpop.eup %1690  ;;  %1710 = vpow2.f32 %v952_v11 }
 0x385   : > { %v979_v56 = vadd.f32 %v2468_v41, %v978_v54  ;;  %v2498_v8 = vpop.eup %1692  ;;  %1712 = vpow2.f32 %v954_v13 }
 0x386   : > { %v2504_v2 = vpop.eup %1694  ;;  %1714 = vpow2.f32 %v956_v17 }
 0x387   : > { %v980_v60 = vadd.f32 %v2471_v44, %v979_v56  ;;  %v2510_v6 = vpop.eup %1696  ;;  %1716 = vpow2.f32 %v958_v10 }
 0x388   : > { %v2516_v12 = vpop.eup %1698  ;;  %1718 = vpow2.f32 %v960_v26 }
 0x389   : > { %v981_v50 = vadd.f32 %v2474_v49, %v980_v60  ;;  %v1701_v16 = vpop.eup %1700  ;;  %1720 = vpow2.f32 %v962_v30 }
 0x38a   : > { %v1703_v32 = vpop.eup %1702  ;;  %1722 = vpow2.f32 %v964_v36 }
 0x38b   : > { %v982_v62 = vadd.f32 %v2480_v51, %v981_v50  ;;  %v1705_v54 = vpop.eup %1704  ;;  %1724 = vpow2.f32 %v966_v40 }
 0x38c   : > { %v1707_v43 = vpop.eup %1706  ;;  %1726 = vpow2.f32 %v968_v34 }
 0x38d   : > { %v983_v14 = vadd.f32 %v2486_v52, %v982_v62  ;;  %v1709_v56 = vpop.eup %1708  ;;  %1728 = vpow2.f32 %v970_v38 }
 0x38e   : > { %v1711_v47 = vpop.eup %1710  ;;  %1730 = vpow2.f32 %v972_v46 }
 0x38f   : > { %v984_v20 = vadd.f32 %v2492_v4, %v983_v14  ;;  %v1713_v60 = vpop.eup %1712 }
 0x390   : > { %v1715_v0 = vpop.eup %1714 }
 0x391   : > { %v985_v24 = vadd.f32 %v2498_v8, %v984_v20  ;;  %v1717_v50 = vpop.eup %1716 }
 0x392   : > { %v1719_v58 = vpop.eup %1718 }
 0x393   : > { %v986_v18 = vadd.f32 %v2504_v2, %v985_v24  ;;  %v1721_v48 = vpop.eup %1720 }
 0x394   : > { %v1723_v61 = vpop.eup %1722 }
 0x395   : > { %v987_v22 = vadd.f32 %v2510_v6, %v986_v18  ;;  %v1725_v63 = vpop.eup %1724 }
 0x396   : > { %v1727_v42 = vpop.eup %1726 }
 0x397   : > { %v988_v28 = vadd.f32 %v2516_v12, %v987_v22  ;;  %v1729_v5 = vpop.eup %1728 }
 0x398   : > { %v1731_v7 = vpop.eup %1730 }
 0x399   : > { %v989_v55 = vadd.f32 %v1701_v16, %v988_v28 }
 0x39b   : > { %v990_v39 = vadd.f32 %v1703_v32, %v989_v55 }
 0x39d   : > { %v991_v19 = vadd.f32 %v1705_v54, %v990_v39 }
 0x39f   : > { %v992_v21 = vadd.f32 %v1707_v43, %v991_v19 }
 0x3a1   : > { %v993_v23 = vadd.f32 %v1709_v56, %v992_v21 }
 0x3a3   : > { %v994_v25 = vadd.f32 %v1711_v47, %v993_v23 }
 0x3a5   : > { %v995_v27 = vadd.f32 %v1713_v60, %v994_v25 }
 0x3a7   : > { %v996_v29 = vadd.f32 %v1715_v0, %v995_v27 }
 0x3a9   : > { %v997_v31 = vadd.f32 %v1717_v50, %v996_v29 }
 0x3ab   : > { %v998_v62 = vadd.f32 %v1719_v58, %v997_v31 }
 0x3ad   : > { %v999_v33 = vadd.f32 %v1721_v48, %v998_v62 }
 0x3af   : > { %v1000_v14 = vadd.f32 %v1723_v61, %v999_v33 }
 0x3b1   : > { %v1001_v20 = vadd.f32 %v1725_v63, %v1000_v14 }
 0x3b3   : > { %v1002_v35 = vadd.f32 %v1727_v42, %v1001_v20 }
 0x3b5   : > { %v1003_v24 = vadd.f32 %v1729_v5, %v1002_v35 }
 0x3b7   : > { %v1004_v18 = vadd.f32 %v1731_v7, %v1003_v24  ;;  %v1065_v24 = vld [vmem:[#allocation4 + $0x28] sm:$0xff] }
 0x3b9   : > { %v1005_v11 = vrot.slane %v1004_v18, 4 }
 0x3bb   : > { %v1006_v45 = vadd.f32 %v1005_v11, %v1004_v18  ;;  %v1144_v11 = vstv %s1143_s13 }
 0x3bd   : > { %v1007_v3 = vrot.slane %v1006_v45, 2 }
 0x3bf   : > { %v1008_v37 = vadd.f32 %v1007_v3, %v1006_v45 }
 0x3c1   : > { %v1009_v22 = vrot.slane %v1008_v37, 1 }
 0x3c3   : > { %v1010_v13 = vadd.f32 %v1009_v22, %v1008_v37  ;;  %v1135_v37 = vld [vmem:[%s2567_s17] sm:$0xff] }
 0x3c5   : > { %1732 = vrcp.f32 %v1010_v13 }
 0x3cf   : > { %v1733_v28 = vpop.eup %1732 }
 0x3d0   : > { %v1028_v17 = vmul.f32 %v1733_v28, %v1701_v16  ;;  %v1029_v55 = vmul.f32 %v1733_v28, %v1703_v32  ;;  %v1012_v10 = vmul.f32 %v1733_v28, %v2450_v53  ;;  %v1013_v39 = vmul.f32 %v1733_v28, %v2452_v59 }
 0x3d1   : > { %v1030_v26 = vmul.f32 %v1733_v28, %v1705_v54  ;;  %v1031_v19 = vmul.f32 %v1733_v28, %v1707_v43  ;;  %v1014_v30 = vmul.f32 %v1733_v28, %v2456_v1  ;;  %v1015_v21 = vmul.f32 %v1733_v28, %v2459_v9 }
 0x3d2   : > { %v1052_v36 = vpack.c.bf16 %v1029_v55, %v1028_v17  ;;  %v1044_v23 = vpack.c.bf16 %v1013_v39, %v1012_v10  ;;  %v1032_v40 = vmul.f32 %v1733_v28, %v1709_v56  ;;  %v1033_v25 = vmul.f32 %v1733_v28, %v1711_v47  ;;  %v1136_v17 = vld [vmem:[%s2567_s17 + $0x10] sm:$0xff] }
 0x3d3   : > { %v1053_v34 = vpack.c.bf16 %v1031_v19, %v1030_v26  ;;  %v1034_v38 = vmul.f32 %v1733_v28, %v1713_v60  ;;  %v1035_v16 = vmul.f32 %v1733_v28, %v1715_v0  ;;  %v1036_v32 = vmul.f32 %v1733_v28, %v1717_v50 }
 0x3d4   : > { %1362 = vmatprep.subr.bf16.mxu1 %v1052_v36  ;;  %v1054_v27 = vpack.c.bf16 %v1033_v25, %v1032_v40  ;;  %v1037_v53 = vmul.f32 %v1733_v28, %v1719_v58  ;;  %v1045_v59 = vpack.c.bf16 %v1015_v21, %v1014_v30  ;;  %v1038_v43 = vmul.f32 %v1733_v28, %v1721_v48  ;;  %v1137_v36 = vld [vmem:[%s2567_s17 + $0x20] sm:$0xff] }
 0x3d5   : > { %1363 = vmatpush3.bf16.msra.mxu1 %v1044_v23  ;;  %v1055_v54 = vpack.c.bf16 %v1035_v16, %v1034_v38  ;;  %v1016_v1 = vmul.f32 %v1733_v28, %v2462_v15  ;;  %v1017_v9 = vmul.f32 %v1733_v28, %v2465_v57  ;;  %v1039_v46 = vmul.f32 %v1733_v28, %v1723_v61 }
 0x3d6   : > { %1364 = vmatprep.subr.bf16.mxu1 %v1053_v34  ;;  %v1056_v29 = vpack.c.bf16 %v1037_v53, %v1036_v32  ;;  %v1040_v56 = vmul.f32 %v1733_v28, %v1725_v63  ;;  %v1041_v47 = vmul.f32 %v1733_v28, %v1727_v42  ;;  %v1042_v62 = vmul.f32 %v1733_v28, %v1729_v5  ;;  %v1138_v34 = vld [vmem:[%s2567_s17 + $0x30] sm:$0xff] }
 0x3d7   : > { %v1057_v31 = vpack.c.bf16 %v1039_v46, %v1038_v43  ;;  %v1043_v0 = vmul.f32 %v1733_v28, %v1731_v7  ;;  %v1046_v50 = vpack.c.bf16 %v1017_v9, %v1016_v1  ;;  %v1018_v58 = vmul.f32 %v1733_v28, %v2468_v41  ;;  %v1067_v7 = vld [vmem:[#allocation4 + $0x38] sm:$0xff]  ;;  %v1140_v46 = vld [vmem:[%s2567_s17 + $0x50] sm:$0xff] }
 0x3d8   : > { %v1058_v60 = vpack.c.bf16 %v1041_v47, %v1040_v56  ;;  %v1019_v33 = vmul.f32 %v1733_v28, %v2471_v44  ;;  %v1020_v57 = vmul.f32 %v1733_v28, %v2474_v49  ;;  %v1021_v61 = vmul.f32 %v1733_v28, %v2480_v51  ;;  %v1139_v43 = vld [vmem:[%s2567_s17 + $0x40] sm:$0xff] }
 0x3d9   : > { %1365 = vmatpush3.bf16.msra.mxu1 %v1045_v59  ;;  %v1059_v48 = vpack.c.bf16 %v1043_v0, %v1042_v62  ;;  %v1022_v63 = vmul.f32 %v1733_v28, %v2486_v52  ;;  %v1023_v20 = vmul.f32 %v1733_v28, %v2492_v4  ;;  %v1024_v44 = vmul.f32 %v1733_v28, %v2498_v8  ;;  %v1060_v52 = vld [vmem:[#allocation4] sm:$0xff]  ;;  %v1063_v4 = vld [vmem:[#allocation4 + $0x18] sm:$0xff]  ;;  %v1062_v8 = vld [vmem:[#allocation4 + $0x10] sm:$0xff] }
 0x3da   : > { %1366 = vmatprep.subr.bf16.mxu1 %v1054_v27  ;;  %v1047_v15 = vpack.c.bf16 %v1019_v33, %v1018_v58  ;;  %v1048_v14 = vpack.c.bf16 %v1021_v61, %v1020_v57  ;;  %v1025_v42 = vmul.f32 %v1733_v28, %v2504_v2  ;;  %v1026_v49 = vmul.f32 %v1733_v28, %v2510_v6  ;;  %v1064_v2 = vld [vmem:[#allocation4 + $0x20] sm:$0xff]  ;;  %v1066_v6 = vld [vmem:[#allocation4 + $0x30] sm:$0xff]  ;;  %v1141_v58 = vld [vmem:[%s2567_s17 + $0x60] sm:$0xff] }
 0x3db   : > { %v1049_v41 = vpack.c.bf16 %v1023_v20, %v1022_v63  ;;  %v1027_v51 = vmul.f32 %v1733_v28, %v2516_v12  ;;  %v1142_v57 = vld [vmem:[%s2567_s17 + $0x70] sm:$0xff] }
 0x3dc   : > { %v1050_v35 = vpack.c.bf16 %v1025_v42, %v1024_v44 }
 0x3dd   : > { %1367 = vmatpush3.bf16.msra.mxu1 %v1046_v50  ;;  %v1051_v5 = vpack.c.bf16 %v1027_v51, %v1026_v49 }
 0x3de   : > { %1368 = vmatprep.subr.bf16.mxu1 %v1055_v54 }
 0x3e1   : > { %1369 = vmatpush3.bf16.msra.mxu1 %v1047_v15 }
 0x3e2   : > { %1370 = vmatprep.subr.bf16.mxu1 %v1056_v29 }
 0x3e5   : > { %1371 = vmatpush3.bf16.msra.mxu1 %v1048_v14 }
 0x3e6   : > { %1372 = vmatprep.subr.bf16.mxu1 %v1057_v31 }
 0x3e9   : > { %1373 = vmatpush3.bf16.msra.mxu1 %v1049_v41 }
 0x3ea   : > { %1374 = vmatprep.subr.bf16.mxu1 %v1058_v60 }
 0x3ed   : > { %1375 = vmatpush3.bf16.msra.mxu1 %v1050_v35 }
 0x3ee   : > { %1376 = vmatprep.subr.bf16.mxu1 %v1059_v48 }
 0x3f1   : > { %1377 = vmatpush3.bf16.msra.mxu1 %v1051_v5 }
 0x3f4   : > { %1101 = vmatmul.mubr.bf16.vlgmr.msra.gmra.mrb[0].mxu1 %v1060_v52 }
 0x3f5   : > { %1108 = vmatprep.mubr.bf16.mxu1 %v1063_v4 }
 0x3fc   : > { %1109 = vmatmul.mubr.bf16.gmra.mrb[4].mxu1 %v1062_v8 }
 0x3fd   : > { %1116 = vmatprep.mubr.bf16.mxu1 %v1065_v24 }
 0x404   : > { %1117 = vmatmul.mubr.bf16.gmra.mrb[8].mxu1 %v1064_v2 }
 0x405   : > { %1124 = vmatprep.mubr.bf16.mxu1 %v1067_v7 }
 0x40c   : > { %1125 = vmatmul.mubr.bf16.gmra.mrb[12].mxu1 %v1066_v6 }
 0x4c7   : > { %v1378_v12 = vpop.f32.mrb[0].mxu1 }
 0x4c8   : > { %v1379_v18 = vpop.f32.mrb[1].mxu1 }
 0x4c9   : > { %v1380_v45 = vadd.f32 %v1379_v18, %v1378_v12  ;;  %v1381_v3 = vpop.f32.mrb[2].mxu1 }
 0x4ca   : > { %v1382_v22 = vpop.f32.mrb[3].mxu1 }
 0x4cb   : > { %v1145_v13 = vmul.f32 %v1380_v45, %v1144_v11  ;;  %v1383_v28 = vadd.f32 %v1382_v22, %v1381_v3 }
 0x4cd   : > { %v1153_v55 = vadd.f32 %v1145_v13, %v1135_v37  ;;  %v1146_v10 = vmul.f32 %v1383_v28, %v1144_v11 }
 0x4cf   : > { %1161 = vst [vmem:[%s2221_s7] sm:$0xff] %v1153_v55  ;;  %v1154_v39 = vadd.f32 %v1146_v10, %v1136_v17  ;;  %v1384_v26 = vpop.f32.mrb[4].mxu1 }
 0x4d0   : > { %v1385_v19 = vpop.f32.mrb[5].mxu1 }
 0x4d1   : > { %1162 = vst [vmem:[%s2221_s7 + $0x8] sm:$0xff] %v1154_v39  ;;  %v1386_v30 = vadd.f32 %v1385_v19, %v1384_v26  ;;  %v1387_v21 = vpop.f32.mrb[6].mxu1 }
 0x4d2   : > { %v1388_v23 = vpop.f32.mrb[7].mxu1 }
 0x4d3   : > { %v1147_v40 = vmul.f32 %v1386_v30, %v1144_v11  ;;  %v1389_v25 = vadd.f32 %v1388_v23, %v1387_v21 }
 0x4d5   : > { %v1155_v27 = vadd.f32 %v1147_v40, %v1137_v36  ;;  %v1148_v38 = vmul.f32 %v1389_v25, %v1144_v11 }
 0x4d7   : > { %1163 = vst [vmem:[%s2221_s7 + $0x10] sm:$0xff] %v1155_v27  ;;  %v1156_v16 = vadd.f32 %v1148_v38, %v1138_v34  ;;  %v1390_v32 = vpop.f32.mrb[8].mxu1 }
 0x4d8   : > { %v1391_v53 = vpop.f32.mrb[9].mxu1 }
 0x4d9   : > { %1164 = vst [vmem:[%s2221_s7 + $0x18] sm:$0xff] %v1156_v16  ;;  %v1392_v59 = vadd.f32 %v1391_v53, %v1390_v32  ;;  %v1393_v54 = vpop.f32.mrb[10].mxu1 }
 0x4da   : > { %v1394_v1 = vpop.f32.mrb[11].mxu1 }
 0x4db   : > { %v1149_v9 = vmul.f32 %v1392_v59, %v1144_v11  ;;  %v1395_v29 = vadd.f32 %v1394_v1, %v1393_v54 }
 0x4dd   : > { %v1157_v56 = vadd.f32 %v1149_v9, %v1139_v43  ;;  %v1150_v47 = vmul.f32 %v1395_v29, %v1144_v11 }
 0x4df   : > { %1165 = vst [vmem:[%s2221_s7 + $0x20] sm:$0xff] %v1157_v56  ;;  %v1158_v31 = vadd.f32 %v1150_v47, %v1140_v46  ;;  %v1396_v62 = vpop.f32.mrb[12].mxu1 }
 0x4e0   : > { %v1397_v60 = vpop.f32.mrb[13].mxu1 }
 0x4e1   : > { %1166 = vst [vmem:[%s2221_s7 + $0x28] sm:$0xff] %v1158_v31  ;;  %v1398_v0 = vadd.f32 %v1397_v60, %v1396_v62  ;;  %v1399_v50 = vpop.f32.mrb[14].mxu1 }
 0x4e2   : > { %v1400_v33 = vpop.f32.mrb[15].mxu1 }
 0x4e3   : > { %v1151_v48 = vmul.f32 %v1398_v0, %v1144_v11  ;;  %v1401_v15 = vadd.f32 %v1400_v33, %v1399_v50 }
 0x4e5   : > { %v1159_v61 = vadd.f32 %v1151_v48, %v1141_v58  ;;  %v1152_v14 = vmul.f32 %v1401_v15, %v1144_v11 }
 0x4e7   : > { %1167 = vst [vmem:[%s2221_s7 + $0x30] sm:$0xff] %v1159_v61  ;;  %v1160_v63 = vadd.f32 %v1152_v14, %v1142_v57 }
 0x4e9   : > { %1168 = vst [vmem:[%s2221_s7 + $0x38] sm:$0xff] %v1160_v63 }
 0x4ea   : > { %1833 = shalt.err (!%p1830_p8)
}
 0x4eb   : > { %s1834_s24 = scalar_lea.hbm %s2591_s23, 1024  ;;  %s1838_s28 = scalar_lea.hbm %s2662_s4, 4096 }
 0x4ec   : > { %p1835_p12 = scmp.ne.s32.totalorder %s2591_s23, %s1834_s24  ;;  %p1839_p10 = scmp.lt.u32.totalorder %s2591_s23, %s2662_s4 }
 0x4ed   : > { %p1840_p0 = scmp.lt.u32.totalorder %s1838_s28, %s1834_s24  ;;  %p1842_p1 = scmp.lt.u32.totalorder %s1834_s24, %s2591_s23 }
 0x4ee   : > { %p1836_p2 = pnand %p1835_p12, %p2692_p3 }
 0x4ef   : > { %p1841_p4 = por %p1840_p0, %p1839_p10 }
 0x4f0   : > { %p1837_p6 = pneg %p1836_p2 }
 0x4f1   : > { %p1843_p13 = por %p1842_p1, %p1841_p4 }
 0x4f3   : > { %p1844_p7 = pnand %p1843_p13, %p1837_p6 }
 0x4f5   : > { %1847 = shalt.err (!%p1844_p7)
}
 0x4f6   : > { %s1959_s17 = smov 128   ;;  %s1960_s30 = smov 256  }
 0x4f7   : > { %s1961_s20 = smov 8  }
 0x4f8   : > { %1455 = dma.vmem_to_hbm [thread:$0]  (%p2692_p3), %s2586_s1, 1024, %s2591_s23, %s2597_s9, %s1959_s17, %s1960_s30, %s1961_s20  }
 0x4f9 PF: > { %s2693_s15 = sld [smem:[#allocation16_spill]]  ;;  %s2694_s3 = sld [smem:[#allocation18_spill]] }
 0x4fa   : > { %p1477_p9 = scmp.ge.s32.totalorder %s1946_s26, 2 }
 0x4ff   : > { %s1199_s11 = sand.u32 1, %s2693_s15   ;;  %p2695_p11 = scmp.ne.s32.totalorder %s2694_s3, 0 }
 0x500   : > { %s1200_s12 = scalar_lea.sflag [#allocation8], %s1199_s11 }
 0x501   : > { %p1469_p5 = pnand %p1477_p9, %p2695_p11 }
 0x503   : > { %1901 = dma.done.wait (!%p1469_p5), %s1200_s12, 1024  }
 0x504   : > { %1903 = vsyncadd (!%p1469_p5), %s1200_s12, 4294966272  ;;  %s22_s26 = sadd.s32 1, %s1946_s26   ;;  %s2696_s23 = sld [smem:[#allocation17_spill]] }
 0x505   : > { %p19_p8 = scmp.ge.s32.totalorder %s22_s26, 6   ;;  %s2697_s24 = sld [smem:[#allocation19_spill]] }
 0x506   : > { %s2698_s17 = smov %s1910_s18  ;;  %s2699_s18 = smov %s1914_s19 }
 0x507   : > { %s2700_s19 = smov %s2165_s2  ;;  %s2701_s20 = smov %s1922_s21 }
 0x508   : > { %s2702_s21 = smov %s1926_s22  ;;  %s2703_s22 = smov %s2160_s14 }
 0x509   : > { %s2704_s3 = smov %s1942_s25  ;;  %s2705_s25 = smov %s2711_s16 }
 0x50a   :  { %21 = sbr.rel (!%p19_p8) target bundleno = 14 (0xe), region = 95 }
 0x511   :  { %1205 = vsyncpa [#allocation7], 1 }
 0x512   :  { %1207 = vsyncpa [#allocation7 + $0x1], 1 }
 0x513   :  { %1208 = vsyncpa [#allocation10], 1 }
 0x514   :  { %1209 = vsyncpa [#allocation8], 1 }
 0x515   :  { %1211 = vsyncpa [#allocation8 + $0x1], 1 }

</bundles_post_ra>
